<compile_context>
chip_gen: v5e
topology: v5e:2x2
jax: 0.10.0
libtpu: 0.0.40
codegen_flags: <defaults>
</compile_context>

<pallas_src>
import functools
import math

import jax
import jax.numpy as jnp
from jax import lax
from jax.experimental import pallas as pl
from jax.experimental.pallas import tpu as pltpu

LN_EPS = 1e-5          # dalle2 LayerNorm eps (fp32)
L2NORM_EPS = 1e-12     # F.normalize eps
VMEM_LIMIT = 48 * 1024 * 1024   # leaves headroom on v7x (64 MiB physical VMEM)


def _cp(dims):
    return pltpu.CompilerParams(dimension_semantics=dims,
                                vmem_limit_bytes=VMEM_LIMIT)


def _round_up(x, m):
    return (x + m - 1) // m * m


def _pad2(a, rows, cols):
    r, c = a.shape
    if (r, c) == (rows, cols):
        return a
    return jnp.pad(a, ((0, rows - r), (0, cols - c)))


def _layernorm_g(x, g, *, stable=False):
    # dalle2_pytorch.LayerNorm: gain only, unbiased=False variance, optional /amax.
    if stable:
        x = x / jnp.max(x, axis=-1, keepdims=True)
    mu = jnp.mean(x, axis=-1, keepdims=True)
    var = jnp.mean((x - mu) ** 2, axis=-1, keepdims=True)
    return (x - mu) * lax.rsqrt(var + LN_EPS) * g


# ---------------------------------------------------------------------------
# Kernel 1: tiled matmul (+ bias), bf16 MXU operands, f32 accumulator scratch
# ---------------------------------------------------------------------------
def _matmul_kernel(x_ref, w_ref, b_ref, o_ref, acc_ref):
    @pl.when(pl.program_id(2) == 0)
    def _init():
        acc_ref[...] = jnp.zeros_like(acc_ref)

    acc_ref[...] += jnp.dot(x_ref[...].astype(jnp.bfloat16), w_ref[...],
                            preferred_element_type=jnp.float32)

    @pl.when(pl.program_id(2) == pl.num_programs(2) - 1)
    def _done():
        o_ref[...] = (acc_ref[...] + b_ref[...]).astype(o_ref.dtype)


def linear(x, w, b=None, *, tm=256, tn=256, tk=512):
    """y = x @ w (+ b).  Tiled (M, N, K) grid, weights streamed as bf16."""
    M, K = x.shape
    _, N = w.shape
    tm = min(tm, _round_up(M, 8))
    tn = min(tn, _round_up(N, 128))
    tk = min(tk, _round_up(K, 128))
    Mp, Np, Kp = _round_up(M, tm), _round_up(N, tn), _round_up(K, tk)
    xp = _pad2(x, Mp, Kp)
    wp = _pad2(w.astype(jnp.bfloat16), Kp, Np)
    bias = jnp.zeros((N,), jnp.float32) if b is None else b.astype(jnp.float32)
    bp = _pad2(bias.reshape(1, N), 1, Np)
    out = pl.pallas_call(
        _matmul_kernel,
        out_shape=jax.ShapeDtypeStruct((Mp, Np), x.dtype),
        grid=(Mp // tm, Np // tn, Kp // tk),
        in_specs=[pl.BlockSpec((tm, tk), lambda i, j, k: (i, k)),
                  pl.BlockSpec((tk, tn), lambda i, j, k: (k, j)),
                  pl.BlockSpec((1, tn), lambda i, j, k: (0, j))],
        out_specs=pl.BlockSpec((tm, tn), lambda i, j, k: (i, j)),
        scratch_shapes=[pltpu.VMEM((tm, tn), jnp.float32)],
        compiler_params=_cp(("parallel", "parallel", "arbitrary")),
    )(xp, wp, bp)
    return out[:M, :N]


# ---------------------------------------------------------------------------
# Row-tiled fused kernels (weights stay VMEM-resident, rows are pipelined)
# ---------------------------------------------------------------------------
def _row_call(kernel, row_ins, full_ins, out_cols, *, tm=256):
    M = row_ins[0].shape[0]
    tm = min(tm, _round_up(M, 8))
    Mp = _round_up(M, tm)
    padded = [_pad2(a, Mp, a.shape[1]) for a in row_ins]
    in_specs = [pl.BlockSpec((tm, a.shape[1]), lambda i: (i, 0)) for a in padded]
    in_specs += [pl.BlockSpec(a.shape, lambda i, _n=a.ndim: (0,) * _n)
                 for a in full_ins]
    out = pl.pallas_call(
        kernel,
        out_shape=jax.ShapeDtypeStruct((Mp, out_cols), jnp.float32),
        grid=(Mp // tm,),
        in_specs=in_specs,
        out_specs=pl.BlockSpec((tm, out_cols), lambda i: (i, 0)),
        compiler_params=_cp(("parallel",)),
    )(*padded, *full_ins)
    return out[:M]


def _ln_linear_kernel(x_ref, g_ref, w_ref, o_ref, *, stable):
    x = x_ref[...].astype(jnp.float32)
    y = _layernorm_g(x, g_ref[...], stable=stable)
    o_ref[...] = jnp.dot(y.astype(jnp.bfloat16), w_ref[...],
                         preferred_element_type=jnp.float32).astype(o_ref.dtype)


def ln_linear(x, g, w, *, stable=False):
    kern = functools.partial(_ln_linear_kernel, stable=stable)
    return _row_call(kern, [x],
                     [g.reshape(1, -1).astype(jnp.float32), w.astype(jnp.bfloat16)],
                     w.shape[1])


def _linear_ln_add_kernel(a_ref, r_ref, w_ref, g_ref, o_ref):
    y = jnp.dot(a_ref[...].astype(jnp.bfloat16), w_ref[...],
                preferred_element_type=jnp.float32)
    y = _layernorm_g(y, g_ref[...])
    o_ref[...] = (y + r_ref[...].astype(jnp.float32)).astype(o_ref.dtype)


def linear_ln_add(a, w, g, residual):
    return _row_call(_linear_ln_add_kernel, [a, residual],
                     [w.astype(jnp.bfloat16), g.reshape(1, -1).astype(jnp.float32)],
                     w.shape[1])


def _ff_kernel(x_ref, g_ref, w1_ref, w2_ref, o_ref):
    x = x_ref[...].astype(jnp.float32)
    y = _layernorm_g(x, g_ref[...])
    h = jnp.dot(y.astype(jnp.bfloat16), w1_ref[...],
                preferred_element_type=jnp.float32)
    inner = h.shape[-1] // 2
    h = h[:, :inner] * jax.nn.silu(h[:, inner:])               # SwiGLU
    y = jnp.dot(h.astype(jnp.bfloat16), w2_ref[...],
                preferred_element_type=jnp.float32)
    o_ref[...] = (y + x).astype(o_ref.dtype)                   # +residual


def ff_residual(x, g, w1, w2):
    return _row_call(_ff_kernel, [x],
                     [g.reshape(1, -1).astype(jnp.float32),
                      w1.astype(jnp.bfloat16), w2.astype(jnp.bfloat16)],
                     w2.shape[1])


# ---------------------------------------------------------------------------
# Kernel: cosine-sim attention core, one (batch, head) per grid step
# ---------------------------------------------------------------------------
def _attn_kernel(q_ref, k_ref, v_ref, bias_ref, o_ref, *, causal, sim_scale):
    q = q_ref[0, 0].astype(jnp.float32)                        # (N, Dh)
    k = k_ref[0].astype(jnp.float32)                           # (J, Dh)  (k/v shared by heads)
    v = v_ref[0].astype(jnp.bfloat16)                          # (J, Dh)
    # cosine-sim attention: l2-normalize q/k, sim scaled by cosine_sim_scale (=16)
    q = q * lax.rsqrt(jnp.sum(q * q, axis=-1, keepdims=True) + L2NORM_EPS)
    k = k * lax.rsqrt(jnp.sum(k * k, axis=-1, keepdims=True) + L2NORM_EPS)
    sim = sim_scale * lax.dot_general(q.astype(jnp.bfloat16), k.astype(jnp.bfloat16),
                                      (((1,), (1,)), ((), ())),
                                      preferred_element_type=jnp.float32)
    sim = sim + bias_ref[0]                                    # T5 rel-pos bias
    n, j = sim.shape
    if causal:
        row = lax.broadcasted_iota(jnp.int32, (n, j), 0)
        col = lax.broadcasted_iota(jnp.int32, (n, j), 1)       # col 0 = null kv
        sim = jnp.where(col > row + (j - n), -jnp.finfo(jnp.float32).max, sim)
    sim = sim - jnp.max(sim, axis=-1, keepdims=True)
    p = jnp.exp(sim)
    p = p / jnp.sum(p, axis=-1, keepdims=True)
    out = jnp.dot(p.astype(jnp.bfloat16), v, preferred_element_type=jnp.float32)
    o_ref[0, 0] = out.astype(o_ref.dtype)


def attention_core(q, k, v, bias, *, causal, cosine_sim_scale=16.0):
    B, H, N, Dh = q.shape
    J = k.shape[1]
    kern = functools.partial(_attn_kernel, causal=causal,
                             sim_scale=float(cosine_sim_scale))
    return pl.pallas_call(
        kern,
        out_shape=jax.ShapeDtypeStruct((B, H, N, Dh), jnp.float32),
        grid=(B, H),
        in_specs=[pl.BlockSpec((1, 1, N, Dh), lambda b, h: (b, h, 0, 0)),
                  pl.BlockSpec((1, J, Dh), lambda b, h: (b, 0, 0)),
                  pl.BlockSpec((1, J, Dh), lambda b, h: (b, 0, 0)),
                  pl.BlockSpec((1, N, J), lambda b, h: (h, 0, 0))],
        out_specs=pl.BlockSpec((1, 1, N, Dh), lambda b, h: (b, h, 0, 0)),
        compiler_params=_cp(("parallel", "parallel")),
    )(q, k, v, bias)


# ---------------------------------------------------------------------------
# Plain-JAX glue (tiny host-side computations)
# ---------------------------------------------------------------------------
def _rotary_inv_freq(dim_head):
    rot_dim = min(32, dim_head)
    return 1.0 / (10000.0 ** (jnp.arange(0, rot_dim, 2, dtype=jnp.float32) / rot_dim))


def _apply_rotary(t, inv_freq):
    # rotary_embedding_torch.rotate_queries_or_keys: interleaved pairs on the first
    # rot_dim channels of the head dim; seq axis is -2; remaining channels pass through.
    rot_dim = 2 * inv_freq.shape[0]
    seq_len = t.shape[-2]
    freqs = jnp.arange(seq_len, dtype=jnp.float32)[:, None] * inv_freq[None, :]
    freqs = jnp.repeat(freqs, 2, axis=-1)                      # (n, rot_dim)
    cos, sin = jnp.cos(freqs), jnp.sin(freqs)
    t_rot, t_pass = t[..., :rot_dim], t[..., rot_dim:]
    pairs = t_rot.reshape(*t_rot.shape[:-1], rot_dim // 2, 2)
    half = jnp.stack([-pairs[..., 1], pairs[..., 0]], axis=-1).reshape(t_rot.shape)
    t_rot = t_rot * cos + half * sin
    return jnp.concatenate([t_rot, t_pass], axis=-1)


def _rel_pos_bias(emb, i, j, *, num_buckets=32, max_distance=128):
    # dalle2_pytorch.RelPosBias(i, j): q_pos = arange(j-i, j), k_pos = arange(j)
    q_pos = jnp.arange(j - i, j)
    k_pos = jnp.arange(j)
    n = jnp.maximum(-(k_pos[None, :] - q_pos[:, None]), 0)
    max_exact = num_buckets // 2
    val_large = max_exact + (
        jnp.log(jnp.maximum(n, 1).astype(jnp.float32) / max_exact)
        / math.log(max_distance / max_exact) * (num_buckets - max_exact)
    ).astype(jnp.int32)
    val_large = jnp.minimum(val_large, num_buckets - 1)
    bucket = jnp.where(n < max_exact, n, val_large)
    values = emb[bucket]                                       # (i, j, heads)
    return jnp.transpose(values, (2, 0, 1)).astype(jnp.float32)


def _prob_mask_like(batch, keep_prob):
    if keep_prob >= 1.0:
        return jnp.ones((batch,), dtype=bool)
    if keep_prob <= 0.0:
        return jnp.zeros((batch,), dtype=bool)
    # TODO(synk): fractional cond-drop probabilities need torch's RNG stream
    # (prob_mask_like); deterministic inference only uses 0.0 / 1.0.
    raise NotImplementedError("fractional cond-drop probabilities not supported")


# ---------------------------------------------------------------------------
# FlaggedCausalTransformer (default flags: norm_in=False, norm_out=True,
# final_proj=True, normformer=False, rotary_emb=True, cosine-sim attention)
# ---------------------------------------------------------------------------
def _attention_block(x, p, attn_bias, inv_freq, *, heads, dim_head, causal):
    B, N, D = x.shape
    inner = heads * dim_head
    x2d = x.reshape(B * N, D)
    # fused pre-norm + packed [q | k | v] projection (to_q / to_kv are bias-free;
    # k and v are single-head, shared across query heads)
    qkv = ln_linear(x2d, p['norm_g'], p['w_qkv']).reshape(B, N, inner + 2 * dim_head)
    q = qkv[..., :inner].reshape(B, N, heads, dim_head).transpose(0, 2, 1, 3)
    k = qkv[..., inner:inner + dim_head]
    v = qkv[..., inner + dim_head:]
    # (torch multiplies q by a scale here; it is a no-op under the cosine-sim
    #  l2-normalization inside the attention kernel, so it is omitted.)
    if inv_freq is not None:
        q = _apply_rotary(q, inv_freq)
        k = _apply_rotary(k, inv_freq)
    # prepend the learned null key/value (classifier-free-guidance token)
    nk = jnp.broadcast_to(p['null_k'][None, None, :], (B, 1, dim_head))
    nv = jnp.broadcast_to(p['null_v'][None, None, :], (B, 1, dim_head))
    k = jnp.concatenate([nk, k], axis=1)
    v = jnp.concatenate([nv, v], axis=1)
    o = attention_core(q, k, v, attn_bias, causal=causal)      # (B, H, N, Dh)
    o = o.transpose(0, 2, 1, 3).reshape(B * N, inner)
    # to_out: Linear(inner, dim, bias=False) -> LayerNorm(dim), then +residual
    return linear_ln_add(o, p['w_out'], p['out_norm_g'], x2d).reshape(B, N, D)


def _causal_transformer(x, p, *, heads, dim_head, causal):
    B, N, D = x.shape
    # TODO(synk): norm_in=True and normformer post-activation norm branches not implemented
    # (module defaults are norm_in=False, normformer=False).
    attn_bias = _rel_pos_bias(p['rel_pos_emb'], N, N + 1)      # (heads, N, N+1)
    inv_freq = p.get('rotary_inv_freq', None)
    for layer in p['layers']:
        x = _attention_block(x, layer['attn'], attn_bias, inv_freq,
                             heads=heads, dim_head=dim_head, causal=causal)
        ff = layer['ff']
        x = ff_residual(x.reshape(B * N, D), ff['norm_g'], ff['w1'],
                        ff['w2']).reshape(B, N, D)
    # norm_out (stable LayerNorm) fused with project_out (Linear, no bias)
    out = ln_linear(x.reshape(B * N, D), p['norm_g'], p['proj_out_w'], stable=True)
    return out.reshape(B, N, D)


# ---------------------------------------------------------------------------
# PriorNetwork forward
# ---------------------------------------------------------------------------
def _to_time_embeds(t, p, *, dim, num_time_embeds):
    # SinusoidalPosEmb(dim) -> MLP(dim, dim*num_time_embeds): Linear+SiLU, Linear+SiLU, Linear
    half = dim // 2
    scale = math.log(10000.0) / (half - 1)
    freqs = jnp.exp(jnp.arange(half, dtype=jnp.float32) * -scale)
    ang = t.astype(jnp.float32)[:, None] * freqs[None, :]
    emb = jnp.concatenate([jnp.sin(ang), jnp.cos(ang)], axis=-1)   # (B, dim)
    h = jax.nn.silu(linear(emb, p['w0'], p['b0']))
    h = jax.nn.silu(linear(h, p['w1'], p['b1']))
    h = linear(h, p['w2'], p['b2'])
    return h.reshape(t.shape[0], num_time_embeds, dim)


def prior_network_forward(image_embed, diffusion_timesteps, params, *,
                          brain_embed=None, text_embed=None,
                          brain_cond_drop_prob=0.0, text_cond_drop_prob=None,
                          image_cond_drop_prob=0.0,
                          heads, dim_head, causal=True,
                          num_time_embeds=1, learned_query_mode='none'):
    if text_embed is not None:
        brain_embed = text_embed
    if text_cond_drop_prob is not None:
        brain_cond_drop_prob = text_cond_drop_prob

    batch, num_tokens, dim = image_embed.shape

    brain_keep = _prob_mask_like(batch, 1.0 - brain_cond_drop_prob)[:, None, None]
    image_keep = _prob_mask_like(batch, 1.0 - image_cond_drop_prob)[:, None, None]
    brain_embed = jnp.where(brain_keep, brain_embed,
                            params['null_brain_embeds'][None].astype(brain_embed.dtype))
    image_embed = jnp.where(image_keep, image_embed,
                            params['null_image_embed'][None].astype(image_embed.dtype))

    # continuous_embedded_time (num_timesteps=None): cast timesteps to embed dtype
    time_embed = _to_time_embeds(diffusion_timesteps.astype(image_embed.dtype),
                                 params['time_mlp'], dim=dim,
                                 num_time_embeds=num_time_embeds)

    if learned_query_mode == 'token':
        learned_queries = jnp.broadcast_to(params['learned_query'][None],
                                           (batch,) + params['learned_query'].shape)
    elif learned_query_mode == 'pos_emb':
        pos = jnp.broadcast_to(params['learned_query'][None],
                               (batch,) + params['learned_query'].shape)
        image_embed = image_embed + pos
        learned_queries = jnp.zeros((batch, 0, dim), image_embed.dtype)
    elif learned_query_mode == 'all_pos_emb':
        pos = jnp.broadcast_to(params['learned_query'][None],
                               (batch,) + params['learned_query'].shape)
        learned_queries = jnp.zeros((batch, 0, dim), image_embed.dtype)
    else:
        learned_queries = jnp.zeros((batch, 0, dim), image_embed.dtype)

    tokens = jnp.concatenate([brain_embed, time_embed, image_embed,
                              learned_queries], axis=-2)
    if learned_query_mode == 'all_pos_emb':
        tokens = tokens + pos

    tokens = _causal_transformer(tokens, params['transformer'],
                                 heads=heads, dim_head=dim_head, causal=causal)
    return tokens[..., -num_tokens:, :]


# ---------------------------------------------------------------------------
# Deterministic synthetic parameter init (shapes follow the module __init__)
# ---------------------------------------------------------------------------
def init_params(key, *, dim, depth, heads, dim_head, num_tokens, ff_mult=4,
                num_time_embeds=1, learned_query_mode='none',
                num_rel_pos_buckets=32, rotary=True):
    keys = iter(jax.random.split(key, 8 + depth * 8))

    def rnd(shape, scale=0.02):
        return jax.random.normal(next(keys), shape, jnp.float32) * scale

    def ones(d):
        return jnp.ones((d,), jnp.float32)

    inner = heads * dim_head
    ff_inner = int(ff_mult * dim)
    hidden_t = int(2 * dim * num_time_embeds)

    layers = []
    for _ in range(depth):
        layers.append(dict(
            attn=dict(norm_g=ones(dim),
                      w_qkv=rnd((dim, inner + 2 * dim_head)),
                      null_k=rnd((dim_head,), 1.0),
                      null_v=rnd((dim_head,), 1.0),
                      w_out=rnd((inner, dim)),
                      out_norm_g=ones(dim)),
            ff=dict(norm_g=ones(dim),
                    w1=rnd((dim, 2 * ff_inner)),
                    w2=rnd((ff_inner, dim)))))

    transformer = dict(layers=layers,
                       rel_pos_emb=rnd((num_rel_pos_buckets, heads), 1.0),
                       norm_g=ones(dim),
                       proj_out_w=rnd((dim, dim)))
    if rotary:
        transformer['rotary_inv_freq'] = _rotary_inv_freq(dim_head)

    params = dict(
        transformer=transformer,
        time_mlp=dict(w0=rnd((dim, hidden_t)), b0=jnp.zeros((hidden_t,), jnp.float32),
                      w1=rnd((hidden_t, hidden_t)), b1=jnp.zeros((hidden_t,), jnp.float32),
                      w2=rnd((hidden_t, dim * num_time_embeds)),
                      b2=jnp.zeros((dim * num_time_embeds,), jnp.float32)),
        null_brain_embeds=rnd((num_tokens, dim), 1.0),
        null_image_embed=rnd((num_tokens, dim), 1.0))

    if learned_query_mode == 'token':
        params['learned_query'] = rnd((num_tokens, dim), 1.0)
    elif learned_query_mode == 'pos_emb':
        params['learned_query'] = rnd((num_tokens, dim), dim ** -0.5)
    elif learned_query_mode == 'all_pos_emb':
        params['learned_query'] = rnd((num_tokens * 2 + 1, dim), dim ** -0.5)
    return params


if __name__ == "__main__":
    # Small config consistent with PriorNetwork(dim, depth, heads, dim_head, num_tokens, ...)
    batch = 2
    num_tokens = 8
    dim = 64
    depth = 2
    heads = 4
    dim_head = 16
    num_time_embeds = 1
    learned_query_mode = 'pos_emb'
    causal = True

    key = jax.random.PRNGKey(0)
    k_img, k_brain, k_t, k_p = jax.random.split(key, 4)
    image_embed = jax.random.normal(k_img, (batch, num_tokens, dim), jnp.float32)
    brain_embed = jax.random.normal(k_brain, (batch, num_tokens, dim), jnp.float32)
    diffusion_timesteps = jax.random.randint(k_t, (batch,), 0, 1000)

    params = init_params(k_p, dim=dim, depth=depth, heads=heads, dim_head=dim_head,
                         num_tokens=num_tokens, num_time_embeds=num_time_embeds,
                         learned_query_mode=learned_query_mode)

    fwd = jax.jit(functools.partial(prior_network_forward,
                                    heads=heads, dim_head=dim_head, causal=causal,
                                    num_time_embeds=num_time_embeds,
                                    learned_query_mode=learned_query_mode))
    out = fwd(image_embed, diffusion_timesteps, params, brain_embed=brain_embed)
    jax.block_until_ready(out)

    assert out.shape == (batch, num_tokens, dim), out.shape
    assert bool(jnp.all(jnp.isfinite(out)))
    print("KERNEL_OK")
</pallas_src>

<mosaic_0001>
module attributes {stable_mosaic.version = 11 : i64} {
  func.func @_matmul_kernel(%arg0: i32, %arg1: i32, %arg2: i32, %arg3: memref<8x128xf32, #tpu.memory_space<vmem>>, %arg4: memref<128x128xbf16, #tpu.memory_space<vmem>>, %arg5: memref<1x128xf32, #tpu.memory_space<vmem>>, %arg6: memref<8x128xf32, #tpu.memory_space<vmem>>, %arg7: memref<8x128xf32, #tpu.memory_space<vmem>>) attributes {dimension_semantics = [#tpu.dimension_semantics<parallel>, #tpu.dimension_semantics<parallel>, #tpu.dimension_semantics<arbitrary>], iteration_bounds = array<i64: 1, 1, 1>, scalar_prefetch = 0 : i64, scratch_operands = 1 : i64, tpu.core_type = #tpu.core_type<tc>, window_params = [{transform_indices = @transform_0, window_bounds = array<i64: 8, 128>}, {transform_indices = @transform_1, window_bounds = array<i64: 128, 128>}, {transform_indices = @transform_2, window_bounds = array<i64: 1, 128>}, {transform_indices = @transform_3, window_bounds = array<i64: 8, 128>}]} {
    %c0_i32 = arith.constant 0 : i32
    %0 = arith.cmpi eq, %arg2, %c0_i32 : i32
    %1 = arith.extui %0 : i1 to i32
    %c0_i32_0 = arith.constant 0 : i32
    %2 = arith.cmpi ne, %1, %c0_i32_0 : i32
    scf.if %2 {
      %cst_10 = arith.constant 0.000000e+00 : f32
      %13 = vector.broadcast %cst_10 : f32 to vector<8x128xf32>
      %c0_11 = arith.constant 0 : index
      %c0_12 = arith.constant 0 : index
      %14 = vector.load %arg7[%c0_11, %c0_12] : memref<8x128xf32, #tpu.memory_space<vmem>>, vector<8x128xf32>
      tpu.vector_store %arg7[%c0_11, %c0_12], %13 {strides = array<i32>} : memref<8x128xf32, #tpu.memory_space<vmem>>, vector<8x128xf32>,
    } else {
    }
    %c0 = arith.constant 0 : index
    %c0_1 = arith.constant 0 : index
    %3 = vector.load %arg7[%c0, %c0_1] : memref<8x128xf32, #tpu.memory_space<vmem>>, vector<8x128xf32>
    %c0_2 = arith.constant 0 : index
    %c0_3 = arith.constant 0 : index
    %4 = vector.load %arg3[%c0_2, %c0_3] : memref<8x128xf32, #tpu.memory_space<vmem>>, vector<8x128xf32>
    %5 = arith.truncf %4 : vector<8x128xf32> to vector<8x128xbf16>
    %c0_4 = arith.constant 0 : index
    %c0_5 = arith.constant 0 : index
    %6 = vector.load %arg4[%c0_4, %c0_5] : memref<128x128xbf16, #tpu.memory_space<vmem>>, vector<128x128xbf16>
    %cst = arith.constant dense<0.000000e+00> : vector<8x128xf32>
    %7 = tpu.matmul %5, %6, %cst {dimension_numbers = #tpu.dot_dimension_numbers<[1], [0], [0], [1], [0, 0, 1, 1], [], []>} : vector<8x128xbf16>, vector<128x128xbf16>, vector<8x128xf32> -> vector<8x128xf32>
    %8 = arith.addf %3, %7 : vector<8x128xf32>
    %c0_6 = arith.constant 0 : index
    %c0_7 = arith.constant 0 : index
    %9 = vector.load %arg7[%c0_6, %c0_7] : memref<8x128xf32, #tpu.memory_space<vmem>>, vector<8x128xf32>
    tpu.vector_store %arg7[%c0_6, %c0_7], %8 {strides = array<i32>} : memref<8x128xf32, #tpu.memory_space<vmem>>, vector<8x128xf32>,
    %c0_i32_8 = arith.constant 0 : i32
    %10 = arith.cmpi eq, %arg2, %c0_i32_8 : i32
    %11 = arith.extui %10 : i1 to i32
    %c0_i32_9 = arith.constant 0 : i32
    %12 = arith.cmpi ne, %11, %c0_i32_9 : i32
    scf.if %12 {
      %c0_10 = arith.constant 0 : index
      %c0_11 = arith.constant 0 : index
      %13 = vector.load %arg7[%c0_10, %c0_11] : memref<8x128xf32, #tpu.memory_space<vmem>>, vector<8x128xf32>
      %c0_12 = arith.constant 0 : index
      %c0_13 = arith.constant 0 : index
      %14 = vector.load %arg5[%c0_12, %c0_13] : memref<1x128xf32, #tpu.memory_space<vmem>>, vector<1x128xf32>
      %15 = vector.broadcast %14 : vector<1x128xf32> to vector<8x128xf32>
      %16 = arith.addf %13, %15 : vector<8x128xf32>
      %c0_14 = arith.constant 0 : index
      %c0_15 = arith.constant 0 : index
      %17 = vector.load %arg6[%c0_14, %c0_15] : memref<8x128xf32, #tpu.memory_space<vmem>>, vector<8x128xf32>
      tpu.vector_store %arg6[%c0_14, %c0_15], %16 {strides = array<i32>} : memref<8x128xf32, #tpu.memory_space<vmem>>, vector<8x128xf32>,
    } else {
    }
    return
  }
  func.func @transform_0(%arg0: i32, %arg1: i32, %arg2: i32) -> (i32, i32) {
    %c0_i32 = arith.constant 0 : i32
    return %arg0, %arg2 : i32, i32
  }
  func.func @transform_1(%arg0: i32, %arg1: i32, %arg2: i32) -> (i32, i32) {
    %c0_i32 = arith.constant 0 : i32
    return %arg2, %arg1 : i32, i32
  }
  func.func @transform_2(%arg0: i32, %arg1: i32, %arg2: i32) -> (i32, i32) {
    %c0_i32 = arith.constant 0 : i32
    %c0_i32_0 = arith.constant 0 : i32
    return %c0_i32, %arg1 : i32, i32
  }
  func.func @transform_3(%arg0: i32, %arg1: i32, %arg2: i32) -> (i32, i32) {
    %c0_i32 = arith.constant 0 : i32
    return %arg0, %arg1 : i32, i32
  }
}

module attributes {stable_mosaic.version = 11 : i64} {
  func.func @_ln_linear_kernel(%arg0: i32, %arg1: memref<40x64xf32, #tpu.memory_space<vmem>>, %arg2: memref<1x64xf32, #tpu.memory_space<vmem>>, %arg3: memref<64x96xbf16, #tpu.memory_space<vmem>>, %arg4: memref<40x96xf32, #tpu.memory_space<vmem>>) attributes {dimension_semantics = [#tpu.dimension_semantics<parallel>], iteration_bounds = array<i64: 1>, scalar_prefetch = 0 : i64, scratch_operands = 0 : i64, tpu.core_type = #tpu.core_type<tc>, window_params = [{transform_indices = @transform_0, window_bounds = array<i64: 40, 64>}, {pipeline_mode = #tpu.pipeline_mode<synchronous>, transform_indices = @transform_1, window_bounds = array<i64: 1, 64>}, {pipeline_mode = #tpu.pipeline_mode<synchronous>, transform_indices = @transform_2, window_bounds = array<i64: 64, 96>}, {transform_indices = @transform_3, window_bounds = array<i64: 40, 96>}]} {
    %c0 = arith.constant 0 : index
    %c0_0 = arith.constant 0 : index
    %0 = vector.load %arg1[%c0, %c0_0] : memref<40x64xf32, #tpu.memory_space<vmem>>, vector<40x64xf32>
    %c0_1 = arith.constant 0 : index
    %c0_2 = arith.constant 0 : index
    %1 = vector.load %arg2[%c0_1, %c0_2] : memref<1x64xf32, #tpu.memory_space<vmem>>, vector<1x64xf32>
    %cst = arith.constant dense<0.000000e+00> : vector<40xf32>
    %2 = vector.multi_reduction <add>, %0, %cst [1] : vector<40x64xf32> to vector<40xf32>
    %3 = vector.shape_cast %2 : vector<40xf32> to vector<40x1xf32>
    %cst_3 = arith.constant 6.400000e+01 : f32
    %4 = vector.broadcast %cst_3 : f32 to vector<40x1xf32>
    %5 = arith.divf %3, %4 : vector<40x1xf32>
    %6 = vector.broadcast %5 : vector<40x1xf32> to vector<40x64xf32>
    %7 = arith.subf %0, %6 : vector<40x64xf32>
    %8 = arith.mulf %7, %7 : vector<40x64xf32>
    %cst_4 = arith.constant dense<0.000000e+00> : vector<40xf32>
    %9 = vector.multi_reduction <add>, %8, %cst_4 [1] : vector<40x64xf32> to vector<40xf32>
    %10 = vector.shape_cast %9 : vector<40xf32> to vector<40x1xf32>
    %cst_5 = arith.constant 6.400000e+01 : f32
    %11 = vector.broadcast %cst_5 : f32 to vector<40x1xf32>
    %12 = arith.divf %10, %11 : vector<40x1xf32>
    %13 = vector.broadcast %5 : vector<40x1xf32> to vector<40x64xf32>
    %14 = arith.subf %0, %13 : vector<40x64xf32>
    %cst_6 = arith.constant 9.99999974E-6 : f32
    %15 = vector.broadcast %cst_6 : f32 to vector<40x1xf32>
    %16 = arith.addf %12, %15 : vector<40x1xf32>
    %17 = math.rsqrt %16 : vector<40x1xf32>
    %18 = vector.broadcast %17 : vector<40x1xf32> to vector<40x64xf32>
    %19 = arith.mulf %14, %18 : vector<40x64xf32>
    %20 = vector.broadcast %1 : vector<1x64xf32> to vector<40x64xf32>
    %21 = arith.mulf %19, %20 : vector<40x64xf32>
    %22 = arith.truncf %21 : vector<40x64xf32> to vector<40x64xbf16>
    %c0_7 = arith.constant 0 : index
    %c0_8 = arith.constant 0 : index
    %23 = vector.load %arg3[%c0_7, %c0_8] : memref<64x96xbf16, #tpu.memory_space<vmem>>, vector<64x96xbf16>
    %cst_9 = arith.constant dense<0.000000e+00> : vector<40x96xf32>
    %24 = tpu.matmul %22, %23, %cst_9 {dimension_numbers = #tpu.dot_dimension_numbers<[1], [0], [0], [1], [0, 0, 1, 1], [], []>} : vector<40x64xbf16>, vector<64x96xbf16>, vector<40x96xf32> -> vector<40x96xf32>
    %c0_10 = arith.constant 0 : index
    %c0_11 = arith.constant 0 : index
    %25 = vector.load %arg4[%c0_10, %c0_11] : memref<40x96xf32, #tpu.memory_space<vmem>>, vector<40x96xf32>
    tpu.vector_store %arg4[%c0_10, %c0_11], %24 {strides = array<i32>} : memref<40x96xf32, #tpu.memory_space<vmem>>, vector<40x96xf32>,
    return
  }
  func.func @transform_0(%arg0: i32) -> (i32, i32) {
    %c0_i32 = arith.constant 0 : i32
    %c0_i32_0 = arith.constant 0 : i32
    return %arg0, %c0_i32 : i32, i32
  }
  func.func @transform_1(%arg0: i32) -> (i32, i32) {
    %c0_i32 = arith.constant 0 : i32
    %c0_i32_0 = arith.constant 0 : i32
    %c0_i32_1 = arith.constant 0 : i32
    return %c0_i32, %c0_i32_0 : i32, i32
  }
  func.func @transform_2(%arg0: i32) -> (i32, i32) {
    %c0_i32 = arith.constant 0 : i32
    %c0_i32_0 = arith.constant 0 : i32
    %c0_i32_1 = arith.constant 0 : i32
    return %c0_i32, %c0_i32_0 : i32, i32
  }
  func.func @transform_3(%arg0: i32) -> (i32, i32) {
    %c0_i32 = arith.constant 0 : i32
    %c0_i32_0 = arith.constant 0 : i32
    return %arg0, %c0_i32 : i32, i32
  }
}

module attributes {stable_mosaic.version = 11 : i64} {
  func.func @_attn_kernel(%arg0: i32, %arg1: i32, %arg2: memref<1x1x17x16xf32, #tpu.memory_space<vmem>>, %arg3: memref<1x18x16xf32, #tpu.memory_space<vmem>>, %arg4: memref<1x18x16xf32, #tpu.memory_space<vmem>>, %arg5: memref<1x17x18xf32, #tpu.memory_space<vmem>>, %arg6: memref<1x1x17x16xf32, #tpu.memory_space<vmem>>) attributes {dimension_semantics = [#tpu.dimension_semantics<parallel>, #tpu.dimension_semantics<parallel>], iteration_bounds = array<i64: 2, 4>, scalar_prefetch = 0 : i64, scratch_operands = 0 : i64, tpu.core_type = #tpu.core_type<tc>, window_params = [{transform_indices = @transform_0, window_bounds = array<i64: 1, 1, 17, 16>}, {transform_indices = @transform_1, window_bounds = array<i64: 1, 18, 16>}, {transform_indices = @transform_2, window_bounds = array<i64: 1, 18, 16>}, {transform_indices = @transform_3, window_bounds = array<i64: 1, 17, 18>}, {transform_indices = @transform_4, window_bounds = array<i64: 1, 1, 17, 16>}]} {
    %c0 = arith.constant 0 : index
    %c0_0 = arith.constant 0 : index
    %c0_1 = arith.constant 0 : index
    %c0_2 = arith.constant 0 : index
    %0 = vector.load %arg2[%c0, %c0_0, %c0_1, %c0_2] : memref<1x1x17x16xf32, #tpu.memory_space<vmem>>, vector<1x1x17x16xf32>
    %1 = vector.shape_cast %0 : vector<1x1x17x16xf32> to vector<17x16xf32>
    %c0_3 = arith.constant 0 : index
    %c0_4 = arith.constant 0 : index
    %c0_5 = arith.constant 0 : index
    %2 = vector.load %arg3[%c0_3, %c0_4, %c0_5] : memref<1x18x16xf32, #tpu.memory_space<vmem>>, vector<1x18x16xf32>
    %3 = vector.shape_cast %2 : vector<1x18x16xf32> to vector<18x16xf32>
    %c0_6 = arith.constant 0 : index
    %c0_7 = arith.constant 0 : index
    %c0_8 = arith.constant 0 : index
    %4 = vector.load %arg4[%c0_6, %c0_7, %c0_8] : memref<1x18x16xf32, #tpu.memory_space<vmem>>, vector<1x18x16xf32>
    %5 = vector.shape_cast %4 : vector<1x18x16xf32> to vector<18x16xf32>
    %6 = arith.truncf %5 : vector<18x16xf32> to vector<18x16xbf16>
    %7 = arith.mulf %1, %1 : vector<17x16xf32>
    %cst = arith.constant dense<0.000000e+00> : vector<17xf32>
    %8 = vector.multi_reduction <add>, %7, %cst [1] : vector<17x16xf32> to vector<17xf32>
    %9 = vector.shape_cast %8 : vector<17xf32> to vector<17x1xf32>
    %cst_9 = arith.constant 9.99999996E-13 : f32
    %10 = vector.broadcast %cst_9 : f32 to vector<17x1xf32>
    %11 = arith.addf %9, %10 : vector<17x1xf32>
    %12 = math.rsqrt %11 : vector<17x1xf32>
    %13 = vector.broadcast %12 : vector<17x1xf32> to vector<17x16xf32>
    %14 = arith.mulf %1, %13 : vector<17x16xf32>
    %15 = arith.mulf %3, %3 : vector<18x16xf32>
    %cst_10 = arith.constant dense<0.000000e+00> : vector<18xf32>
    %16 = vector.multi_reduction <add>, %15, %cst_10 [1] : vector<18x16xf32> to vector<18xf32>
    %17 = vector.shape_cast %16 : vector<18xf32> to vector<18x1xf32>
    %cst_11 = arith.constant 9.99999996E-13 : f32
    %18 = vector.broadcast %cst_11 : f32 to vector<18x1xf32>
    %19 = arith.addf %17, %18 : vector<18x1xf32>
    %20 = math.rsqrt %19 : vector<18x1xf32>
    %21 = vector.broadcast %20 : vector<18x1xf32> to vector<18x16xf32>
    %22 = arith.mulf %3, %21 : vector<18x16xf32>
    %23 = arith.truncf %14 : vector<17x16xf32> to vector<17x16xbf16>
    %24 = arith.truncf %22 : vector<18x16xf32> to vector<18x16xbf16>
    %cst_12 = arith.constant dense<0.000000e+00> : vector<17x18xf32>
    %25 = tpu.matmul %23, %24, %cst_12 {dimension_numbers = #tpu.dot_dimension_numbers<[1], [1], [0], [0], [0, 0, 1, 0], [], []>} : vector<17x16xbf16>, vector<18x16xbf16>, vector<17x18xf32> -> vector<17x18xf32>
    %cst_13 = arith.constant 1.600000e+01 : f32
    %26 = vector.broadcast %cst_13 : f32 to vector<17x18xf32>
    %27 = arith.mulf %26, %25 : vector<17x18xf32>
    %c0_14 = arith.constant 0 : index
    %c0_15 = arith.constant 0 : index
    %c0_16 = arith.constant 0 : index
    %28 = vector.load %arg5[%c0_14, %c0_15, %c0_16] : memref<1x17x18xf32, #tpu.memory_space<vmem>>, vector<1x17x18xf32>
    %29 = vector.shape_cast %28 : vector<1x17x18xf32> to vector<17x18xf32>
    %30 = arith.addf %27, %29 : vector<17x18xf32>
    %31 = tpu.iota {dimensions = array<i32: 0>} : vector<17x18xi32>
    %32 = tpu.iota {dimensions = array<i32: 1>} : vector<17x18xi32>
    %c1_i32 = arith.constant 1 : i32
    %33 = vector.broadcast %c1_i32 : i32 to vector<17x18xi32>
    %34 = arith.addi %31, %33 : vector<17x18xi32>
    %35 = arith.cmpi sgt, %32, %34 : vector<17x18xi32>
    %cst_17 = arith.constant -3.40282347E+38 : f32
    %36 = vector.broadcast %cst_17 : f32 to vector<17x18xf32>
    %37 = arith.select %35, %36, %30 : vector<17x18xi1>, vector<17x18xf32>
    %cst_18 = arith.constant dense<0xFF800000> : vector<17xf32>
    %38 = vector.multi_reduction <maximumf>, %37, %cst_18 [1] : vector<17x18xf32> to vector<17xf32>
    %39 = vector.shape_cast %38 : vector<17xf32> to vector<17x1xf32>
    %40 = vector.broadcast %39 : vector<17x1xf32> to vector<17x18xf32>
    %41 = arith.subf %37, %40 : vector<17x18xf32>
    %42 = math.exp %41 : vector<17x18xf32>
    %cst_19 = arith.constant dense<0.000000e+00> : vector<17xf32>
    %43 = vector.multi_reduction <add>, %42, %cst_19 [1] : vector<17x18xf32> to vector<17xf32>
    %44 = vector.shape_cast %43 : vector<17xf32> to vector<17x1xf32>
    %45 = vector.broadcast %44 : vector<17x1xf32> to vector<17x18xf32>
    %46 = arith.divf %42, %45 : vector<17x18xf32>
    %47 = arith.truncf %46 : vector<17x18xf32> to vector<17x18xbf16>
    %cst_20 = arith.constant dense<0.000000e+00> : vector<17x16xf32>
    %48 = tpu.matmul %47, %6, %cst_20 {dimension_numbers = #tpu.dot_dimension_numbers<[1], [0], [0], [1], [0, 0, 1, 1], [], []>} : vector<17x18xbf16>, vector<18x16xbf16>, vector<17x16xf32> -> vector<17x16xf32>
    %c0_21 = arith.constant 0 : index
    %c0_22 = arith.constant 0 : index
    %c0_23 = arith.constant 0 : index
    %c0_24 = arith.constant 0 : index
    %49 = vector.load %arg6[%c0_21, %c0_22, %c0_23, %c0_24] : memref<1x1x17x16xf32, #tpu.memory_space<vmem>>, vector<1x1x17x16xf32>
    %50 = vector.shape_cast %49 : vector<1x1x17x16xf32> to vector<17x16xf32>
    %51 = vector.shape_cast %48 : vector<17x16xf32> to vector<1x1x17x16xf32>
    tpu.vector_store %arg6[%c0_21, %c0_22, %c0_23, %c0_24], %51 {strides = array<i32>} : memref<1x1x17x16xf32, #tpu.memory_space<vmem>>, vector<1x1x17x16xf32>,
    return
  }
  func.func @transform_0(%arg0: i32, %arg1: i32) -> (i32, i32, i32, i32) {
    %c0_i32 = arith.constant 0 : i32
    %c0_i32_0 = arith.constant 0 : i32
    %c0_i32_1 = arith.constant 0 : i32
    return %arg0, %arg1, %c0_i32, %c0_i32_0 : i32, i32, i32, i32
  }
  func.func @transform_1(%arg0: i32, %arg1: i32) -> (i32, i32, i32) {
    %c0_i32 = arith.constant 0 : i32
    %c0_i32_0 = arith.constant 0 : i32
    %c0_i32_1 = arith.constant 0 : i32
    return %arg0, %c0_i32, %c0_i32_0 : i32, i32, i32
  }
  func.func @transform_2(%arg0: i32, %arg1: i32) -> (i32, i32, i32) {
    %c0_i32 = arith.constant 0 : i32
    %c0_i32_0 = arith.constant 0 : i32
    %c0_i32_1 = arith.constant 0 : i32
    return %arg0, %c0_i32, %c0_i32_0 : i32, i32, i32
  }
  func.func @transform_3(%arg0: i32, %arg1: i32) -> (i32, i32, i32) {
    %c0_i32 = arith.constant 0 : i32
    %c0_i32_0 = arith.constant 0 : i32
    %c0_i32_1 = arith.constant 0 : i32
    return %arg1, %c0_i32, %c0_i32_0 : i32, i32, i32
  }
  func.func @transform_4(%arg0: i32, %arg1: i32) -> (i32, i32, i32, i32) {
    %c0_i32 = arith.constant 0 : i32
    %c0_i32_0 = arith.constant 0 : i32
    %c0_i32_1 = arith.constant 0 : i32
    return %arg0, %arg1, %c0_i32, %c0_i32_0 : i32, i32, i32, i32
  }
}

module attributes {stable_mosaic.version = 11 : i64} {
  func.func @_linear_ln_add_kernel(%arg0: i32, %arg1: memref<40x64xf32, #tpu.memory_space<vmem>>, %arg2: memref<40x64xf32, #tpu.memory_space<vmem>>, %arg3: memref<64x64xbf16, #tpu.memory_space<vmem>>, %arg4: memref<1x64xf32, #tpu.memory_space<vmem>>, %arg5: memref<40x64xf32, #tpu.memory_space<vmem>>) attributes {dimension_semantics = [#tpu.dimension_semantics<parallel>], iteration_bounds = array<i64: 1>, scalar_prefetch = 0 : i64, scratch_operands = 0 : i64, tpu.core_type = #tpu.core_type<tc>, window_params = [{transform_indices = @transform_0, window_bounds = array<i64: 40, 64>}, {transform_indices = @transform_1, window_bounds = array<i64: 40, 64>}, {pipeline_mode = #tpu.pipeline_mode<synchronous>, transform_indices = @transform_2, window_bounds = array<i64: 64, 64>}, {pipeline_mode = #tpu.pipeline_mode<synchronous>, transform_indices = @transform_3, window_bounds = array<i64: 1, 64>}, {transform_indices = @transform_4, window_bounds = array<i64: 40, 64>}]} {
    %c0 = arith.constant 0 : index
    %c0_0 = arith.constant 0 : index
    %0 = vector.load %arg1[%c0, %c0_0] : memref<40x64xf32, #tpu.memory_space<vmem>>, vector<40x64xf32>
    %1 = arith.truncf %0 : vector<40x64xf32> to vector<40x64xbf16>
    %c0_1 = arith.constant 0 : index
    %c0_2 = arith.constant 0 : index
    %2 = vector.load %arg3[%c0_1, %c0_2] : memref<64x64xbf16, #tpu.memory_space<vmem>>, vector<64x64xbf16>
    %cst = arith.constant dense<0.000000e+00> : vector<40x64xf32>
    %3 = tpu.matmul %1, %2, %cst {dimension_numbers = #tpu.dot_dimension_numbers<[1], [0], [0], [1], [0, 0, 1, 1], [], []>} : vector<40x64xbf16>, vector<64x64xbf16>, vector<40x64xf32> -> vector<40x64xf32>
    %c0_3 = arith.constant 0 : index
    %c0_4 = arith.constant 0 : index
    %4 = vector.load %arg4[%c0_3, %c0_4] : memref<1x64xf32, #tpu.memory_space<vmem>>, vector<1x64xf32>
    %cst_5 = arith.constant dense<0.000000e+00> : vector<40xf32>
    %5 = vector.multi_reduction <add>, %3, %cst_5 [1] : vector<40x64xf32> to vector<40xf32>
    %6 = vector.shape_cast %5 : vector<40xf32> to vector<40x1xf32>
    %cst_6 = arith.constant 6.400000e+01 : f32
    %7 = vector.broadcast %cst_6 : f32 to vector<40x1xf32>
    %8 = arith.divf %6, %7 : vector<40x1xf32>
    %9 = vector.broadcast %8 : vector<40x1xf32> to vector<40x64xf32>
    %10 = arith.subf %3, %9 : vector<40x64xf32>
    %11 = arith.mulf %10, %10 : vector<40x64xf32>
    %cst_7 = arith.constant dense<0.000000e+00> : vector<40xf32>
    %12 = vector.multi_reduction <add>, %11, %cst_7 [1] : vector<40x64xf32> to vector<40xf32>
    %13 = vector.shape_cast %12 : vector<40xf32> to vector<40x1xf32>
    %cst_8 = arith.constant 6.400000e+01 : f32
    %14 = vector.broadcast %cst_8 : f32 to vector<40x1xf32>
    %15 = arith.divf %13, %14 : vector<40x1xf32>
    %16 = vector.broadcast %8 : vector<40x1xf32> to vector<40x64xf32>
    %17 = arith.subf %3, %16 : vector<40x64xf32>
    %cst_9 = arith.constant 9.99999974E-6 : f32
    %18 = vector.broadcast %cst_9 : f32 to vector<40x1xf32>
    %19 = arith.addf %15, %18 : vector<40x1xf32>
    %20 = math.rsqrt %19 : vector<40x1xf32>
    %21 = vector.broadcast %20 : vector<40x1xf32> to vector<40x64xf32>
    %22 = arith.mulf %17, %21 : vector<40x64xf32>
    %23 = vector.broadcast %4 : vector<1x64xf32> to vector<40x64xf32>
    %24 = arith.mulf %22, %23 : vector<40x64xf32>
    %c0_10 = arith.constant 0 : index
    %c0_11 = arith.constant 0 : index
    %25 = vector.load %arg2[%c0_10, %c0_11] : memref<40x64xf32, #tpu.memory_space<vmem>>, vector<40x64xf32>
    %26 = arith.addf %24, %25 : vector<40x64xf32>
    %c0_12 = arith.constant 0 : index
    %c0_13 = arith.constant 0 : index
    %27 = vector.load %arg5[%c0_12, %c0_13] : memref<40x64xf32, #tpu.memory_space<vmem>>, vector<40x64xf32>
    tpu.vector_store %arg5[%c0_12, %c0_13], %26 {strides = array<i32>} : memref<40x64xf32, #tpu.memory_space<vmem>>, vector<40x64xf32>,
    return
  }
  func.func @transform_0(%arg0: i32) -> (i32, i32) {
    %c0_i32 = arith.constant 0 : i32
    %c0_i32_0 = arith.constant 0 : i32
    return %arg0, %c0_i32 : i32, i32
  }
  func.func @transform_1(%arg0: i32) -> (i32, i32) {
    %c0_i32 = arith.constant 0 : i32
    %c0_i32_0 = arith.constant 0 : i32
    return %arg0, %c0_i32 : i32, i32
  }
  func.func @transform_2(%arg0: i32) -> (i32, i32) {
    %c0_i32 = arith.constant 0 : i32
    %c0_i32_0 = arith.constant 0 : i32
    %c0_i32_1 = arith.constant 0 : i32
    return %c0_i32, %c0_i32_0 : i32, i32
  }
  func.func @transform_3(%arg0: i32) -> (i32, i32) {
    %c0_i32 = arith.constant 0 : i32
    %c0_i32_0 = arith.constant 0 : i32
    %c0_i32_1 = arith.constant 0 : i32
    return %c0_i32, %c0_i32_0 : i32, i32
  }
  func.func @transform_4(%arg0: i32) -> (i32, i32) {
    %c0_i32 = arith.constant 0 : i32
    %c0_i32_0 = arith.constant 0 : i32
    return %arg0, %c0_i32 : i32, i32
  }
}

module attributes {stable_mosaic.version = 11 : i64} {
  func.func @_ff_kernel(%arg0: i32, %arg1: memref<40x64xf32, #tpu.memory_space<vmem>>, %arg2: memref<1x64xf32, #tpu.memory_space<vmem>>, %arg3: memref<64x512xbf16, #tpu.memory_space<vmem>>, %arg4: memref<256x64xbf16, #tpu.memory_space<vmem>>, %arg5: memref<40x64xf32, #tpu.memory_space<vmem>>) attributes {dimension_semantics = [#tpu.dimension_semantics<parallel>], iteration_bounds = array<i64: 1>, scalar_prefetch = 0 : i64, scratch_operands = 0 : i64, tpu.core_type = #tpu.core_type<tc>, window_params = [{transform_indices = @transform_0, window_bounds = array<i64: 40, 64>}, {pipeline_mode = #tpu.pipeline_mode<synchronous>, transform_indices = @transform_1, window_bounds = array<i64: 1, 64>}, {pipeline_mode = #tpu.pipeline_mode<synchronous>, transform_indices = @transform_2, window_bounds = array<i64: 64, 512>}, {pipeline_mode = #tpu.pipeline_mode<synchronous>, transform_indices = @transform_3, window_bounds = array<i64: 256, 64>}, {transform_indices = @transform_4, window_bounds = array<i64: 40, 64>}]} {
    %c0 = arith.constant 0 : index
    %c0_0 = arith.constant 0 : index
    %0 = vector.load %arg1[%c0, %c0_0] : memref<40x64xf32, #tpu.memory_space<vmem>>, vector<40x64xf32>
    %c0_1 = arith.constant 0 : index
    %c0_2 = arith.constant 0 : index
    %1 = vector.load %arg2[%c0_1, %c0_2] : memref<1x64xf32, #tpu.memory_space<vmem>>, vector<1x64xf32>
    %cst = arith.constant dense<0.000000e+00> : vector<40xf32>
    %2 = vector.multi_reduction <add>, %0, %cst [1] : vector<40x64xf32> to vector<40xf32>
    %3 = vector.shape_cast %2 : vector<40xf32> to vector<40x1xf32>
    %cst_3 = arith.constant 6.400000e+01 : f32
    %4 = vector.broadcast %cst_3 : f32 to vector<40x1xf32>
    %5 = arith.divf %3, %4 : vector<40x1xf32>
    %6 = vector.broadcast %5 : vector<40x1xf32> to vector<40x64xf32>
    %7 = arith.subf %0, %6 : vector<40x64xf32>
    %8 = arith.mulf %7, %7 : vector<40x64xf32>
    %cst_4 = arith.constant dense<0.000000e+00> : vector<40xf32>
    %9 = vector.multi_reduction <add>, %8, %cst_4 [1] : vector<40x64xf32> to vector<40xf32>
    %10 = vector.shape_cast %9 : vector<40xf32> to vector<40x1xf32>
    %cst_5 = arith.constant 6.400000e+01 : f32
    %11 = vector.broadcast %cst_5 : f32 to vector<40x1xf32>
    %12 = arith.divf %10, %11 : vector<40x1xf32>
    %13 = vector.broadcast %5 : vector<40x1xf32> to vector<40x64xf32>
    %14 = arith.subf %0, %13 : vector<40x64xf32>
    %cst_6 = arith.constant 9.99999974E-6 : f32
    %15 = vector.broadcast %cst_6 : f32 to vector<40x1xf32>
    %16 = arith.addf %12, %15 : vector<40x1xf32>
    %17 = math.rsqrt %16 : vector<40x1xf32>
    %18 = vector.broadcast %17 : vector<40x1xf32> to vector<40x64xf32>
    %19 = arith.mulf %14, %18 : vector<40x64xf32>
    %20 = vector.broadcast %1 : vector<1x64xf32> to vector<40x64xf32>
    %21 = arith.mulf %19, %20 : vector<40x64xf32>
    %22 = arith.truncf %21 : vector<40x64xf32> to vector<40x64xbf16>
    %c0_7 = arith.constant 0 : index
    %c0_8 = arith.constant 0 : index
    %23 = vector.load %arg3[%c0_7, %c0_8] : memref<64x512xbf16, #tpu.memory_space<vmem>>, vector<64x512xbf16>
    %cst_9 = arith.constant dense<0.000000e+00> : vector<40x512xf32>
    %24 = tpu.matmul %22, %23, %cst_9 {dimension_numbers = #tpu.dot_dimension_numbers<[1], [0], [0], [1], [0, 0, 1, 1], [], []>} : vector<40x64xbf16>, vector<64x512xbf16>, vector<40x512xf32> -> vector<40x512xf32>
    %25 = vector.extract_strided_slice %24 {offsets = [0, 0], sizes = [40, 256], strides = [1, 1]} : vector<40x512xf32> to vector<40x256xf32>
    %26 = vector.extract_strided_slice %24 {offsets = [0, 256], sizes = [40, 256], strides = [1, 1]} : vector<40x512xf32> to vector<40x256xf32>
    %27 = arith.negf %26 : vector<40x256xf32>
    %28 = math.exp %27 : vector<40x256xf32>
    %cst_10 = arith.constant 1.000000e+00 : f32
    %29 = vector.broadcast %cst_10 : f32 to vector<40x256xf32>
    %30 = arith.addf %29, %28 : vector<40x256xf32>
    %31 = arith.divf %29, %30 : vector<40x256xf32>
    %32 = arith.mulf %26, %31 : vector<40x256xf32>
    %33 = arith.mulf %25, %32 : vector<40x256xf32>
    %34 = arith.truncf %33 : vector<40x256xf32> to vector<40x256xbf16>
    %c0_11 = arith.constant 0 : index
    %c0_12 = arith.constant 0 : index
    %35 = vector.load %arg4[%c0_11, %c0_12] : memref<256x64xbf16, #tpu.memory_space<vmem>>, vector<256x64xbf16>
    %cst_13 = arith.constant dense<0.000000e+00> : vector<40x64xf32>
    %36 = tpu.matmul %34, %35, %cst_13 {dimension_numbers = #tpu.dot_dimension_numbers<[1], [0], [0], [1], [0, 0, 1, 1], [], []>} : vector<40x256xbf16>, vector<256x64xbf16>, vector<40x64xf32> -> vector<40x64xf32>
    %37 = arith.addf %36, %0 : vector<40x64xf32>
    %c0_14 = arith.constant 0 : index
    %c0_15 = arith.constant 0 : index
    %38 = vector.load %arg5[%c0_14, %c0_15] : memref<40x64xf32, #tpu.memory_space<vmem>>, vector<40x64xf32>
    tpu.vector_store %arg5[%c0_14, %c0_15], %37 {strides = array<i32>} : memref<40x64xf32, #tpu.memory_space<vmem>>, vector<40x64xf32>,
    return
  }
  func.func @transform_0(%arg0: i32) -> (i32, i32) {
    %c0_i32 = arith.constant 0 : i32
    %c0_i32_0 = arith.constant 0 : i32
    return %arg0, %c0_i32 : i32, i32
  }
  func.func @transform_1(%arg0: i32) -> (i32, i32) {
    %c0_i32 = arith.constant 0 : i32
    %c0_i32_0 = arith.constant 0 : i32
    %c0_i32_1 = arith.constant 0 : i32
    return %c0_i32, %c0_i32_0 : i32, i32
  }
  func.func @transform_2(%arg0: i32) -> (i32, i32) {
    %c0_i32 = arith.constant 0 : i32
    %c0_i32_0 = arith.constant 0 : i32
    %c0_i32_1 = arith.constant 0 : i32
    return %c0_i32, %c0_i32_0 : i32, i32
  }
  func.func @transform_3(%arg0: i32) -> (i32, i32) {
    %c0_i32 = arith.constant 0 : i32
    %c0_i32_0 = arith.constant 0 : i32
    %c0_i32_1 = arith.constant 0 : i32
    return %c0_i32, %c0_i32_0 : i32, i32
  }
  func.func @transform_4(%arg0: i32) -> (i32, i32) {
    %c0_i32 = arith.constant 0 : i32
    %c0_i32_0 = arith.constant 0 : i32
    return %arg0, %c0_i32 : i32, i32
  }
}

module attributes {stable_mosaic.version = 11 : i64} {
  func.func @_ln_linear_kernel(%arg0: i32, %arg1: memref<40x64xf32, #tpu.memory_space<vmem>>, %arg2: memref<1x64xf32, #tpu.memory_space<vmem>>, %arg3: memref<64x64xbf16, #tpu.memory_space<vmem>>, %arg4: memref<40x64xf32, #tpu.memory_space<vmem>>) attributes {dimension_semantics = [#tpu.dimension_semantics<parallel>], iteration_bounds = array<i64: 1>, scalar_prefetch = 0 : i64, scratch_operands = 0 : i64, tpu.core_type = #tpu.core_type<tc>, window_params = [{transform_indices = @transform_0, window_bounds = array<i64: 40, 64>}, {pipeline_mode = #tpu.pipeline_mode<synchronous>, transform_indices = @transform_1, window_bounds = array<i64: 1, 64>}, {pipeline_mode = #tpu.pipeline_mode<synchronous>, transform_indices = @transform_2, window_bounds = array<i64: 64, 64>}, {transform_indices = @transform_3, window_bounds = array<i64: 40, 64>}]} {
    %c0 = arith.constant 0 : index
    %c0_0 = arith.constant 0 : index
    %0 = vector.load %arg1[%c0, %c0_0] : memref<40x64xf32, #tpu.memory_space<vmem>>, vector<40x64xf32>
    %c0_1 = arith.constant 0 : index
    %c0_2 = arith.constant 0 : index
    %1 = vector.load %arg2[%c0_1, %c0_2] : memref<1x64xf32, #tpu.memory_space<vmem>>, vector<1x64xf32>
    %cst = arith.constant dense<0xFF800000> : vector<40xf32>
    %2 = vector.multi_reduction <maximumf>, %0, %cst [1] : vector<40x64xf32> to vector<40xf32>
    %3 = vector.shape_cast %2 : vector<40xf32> to vector<40x1xf32>
    %4 = vector.broadcast %3 : vector<40x1xf32> to vector<40x64xf32>
    %5 = arith.divf %0, %4 : vector<40x64xf32>
    %cst_3 = arith.constant dense<0.000000e+00> : vector<40xf32>
    %6 = vector.multi_reduction <add>, %5, %cst_3 [1] : vector<40x64xf32> to vector<40xf32>
    %7 = vector.shape_cast %6 : vector<40xf32> to vector<40x1xf32>
    %cst_4 = arith.constant 6.400000e+01 : f32
    %8 = vector.broadcast %cst_4 : f32 to vector<40x1xf32>
    %9 = arith.divf %7, %8 : vector<40x1xf32>
    %10 = vector.broadcast %9 : vector<40x1xf32> to vector<40x64xf32>
    %11 = arith.subf %5, %10 : vector<40x64xf32>
    %12 = arith.mulf %11, %11 : vector<40x64xf32>
    %cst_5 = arith.constant dense<0.000000e+00> : vector<40xf32>
    %13 = vector.multi_reduction <add>, %12, %cst_5 [1] : vector<40x64xf32> to vector<40xf32>
    %14 = vector.shape_cast %13 : vector<40xf32> to vector<40x1xf32>
    %cst_6 = arith.constant 6.400000e+01 : f32
    %15 = vector.broadcast %cst_6 : f32 to vector<40x1xf32>
    %16 = arith.divf %14, %15 : vector<40x1xf32>
    %17 = vector.broadcast %9 : vector<40x1xf32> to vector<40x64xf32>
    %18 = arith.subf %5, %17 : vector<40x64xf32>
    %cst_7 = arith.constant 9.99999974E-6 : f32
    %19 = vector.broadcast %cst_7 : f32 to vector<40x1xf32>
    %20 = arith.addf %16, %19 : vector<40x1xf32>
    %21 = math.rsqrt %20 : vector<40x1xf32>
    %22 = vector.broadcast %21 : vector<40x1xf32> to vector<40x64xf32>
    %23 = arith.mulf %18, %22 : vector<40x64xf32>
    %24 = vector.broadcast %1 : vector<1x64xf32> to vector<40x64xf32>
    %25 = arith.mulf %23, %24 : vector<40x64xf32>
    %26 = arith.truncf %25 : vector<40x64xf32> to vector<40x64xbf16>
    %c0_8 = arith.constant 0 : index
    %c0_9 = arith.constant 0 : index
    %27 = vector.load %arg3[%c0_8, %c0_9] : memref<64x64xbf16, #tpu.memory_space<vmem>>, vector<64x64xbf16>
    %cst_10 = arith.constant dense<0.000000e+00> : vector<40x64xf32>
    %28 = tpu.matmul %26, %27, %cst_10 {dimension_numbers = #tpu.dot_dimension_numbers<[1], [0], [0], [1], [0, 0, 1, 1], [], []>} : vector<40x64xbf16>, vector<64x64xbf16>, vector<40x64xf32> -> vector<40x64xf32>
    %c0_11 = arith.constant 0 : index
    %c0_12 = arith.constant 0 : index
    %29 = vector.load %arg4[%c0_11, %c0_12] : memref<40x64xf32, #tpu.memory_space<vmem>>, vector<40x64xf32>
    tpu.vector_store %arg4[%c0_11, %c0_12], %28 {strides = array<i32>} : memref<40x64xf32, #tpu.memory_space<vmem>>, vector<40x64xf32>,
    return
  }
  func.func @transform_0(%arg0: i32) -> (i32, i32) {
    %c0_i32 = arith.constant 0 : i32
    %c0_i32_0 = arith.constant 0 : i32
    return %arg0, %c0_i32 : i32, i32
  }
  func.func @transform_1(%arg0: i32) -> (i32, i32) {
    %c0_i32 = arith.constant 0 : i32
    %c0_i32_0 = arith.constant 0 : i32
    %c0_i32_1 = arith.constant 0 : i32
    return %c0_i32, %c0_i32_0 : i32, i32
  }
  func.func @transform_2(%arg0: i32) -> (i32, i32) {
    %c0_i32 = arith.constant 0 : i32
    %c0_i32_0 = arith.constant 0 : i32
    %c0_i32_1 = arith.constant 0 : i32
    return %c0_i32, %c0_i32_0 : i32, i32
  }
  func.func @transform_3(%arg0: i32) -> (i32, i32) {
    %c0_i32 = arith.constant 0 : i32
    %c0_i32_0 = arith.constant 0 : i32
    return %arg0, %c0_i32 : i32, i32
  }
}

</mosaic_0001>

<bundles_post_ra>
// kernel: prior_network_forward.15
= control target key start
LH: loop header
LB: loop body
LE: loop exit
PB: predicated region body
PF: predicated region fallthrough
CT: control target
= control target key end

     0   :  { %vm21_vm0 = vcmask 523264   ;;  %v269_v10 = vmov 64.0   ;;  %s385_s0 = inlined_call_operand.vmem [shape: f32[40,64], index: 0, kind: input, shape index: {}]   ;;  %s386_s1 = inlined_call_operand.vmem [shape: f32[1,64], index: 1, kind: input, shape index: {}]   ;;  %s387_s2 = inlined_call_operand.vmem [shape: bf16[64,96], index: 2, kind: input, shape index: {}]   ;;  %s388_s3 = inlined_call_operand.vmem [shape: f32[40,96], index: 3, kind: output, shape index: {}]  }
   0x1   :  { %v19_v0 = vld [vmem:[%s385_s0 + $0x20] sm:$0xff]  ;;  %v16_v1 = vld [vmem:[%s385_s0 + $0x8] sm:$0xff]  ;;  %v18_v4 = vld [vmem:[%s385_s0 + $0x18] sm:$0xff]  ;;  %257 = vrcp.f32 %v269_v10 }
   0x2   :  { %v34_v2 = vsel %vm21_vm0, %v19_v0, 0.0  ;;  %v25_v3 = vsel %vm21_vm0, %v16_v1, 0.0  ;;  %v31_v5 = vsel %vm21_vm0, %v18_v4, 0.0  ;;  %v17_v6 = vld [vmem:[%s385_s0 + $0x10] sm:$0xff]  ;;  %v15_v7 = vld [vmem:[%s385_s0] sm:$0xff]  ;;  %v246_v42 = vld [vmem:[%s387_s2 + $0x18] sm:$0xff] }
   0x3   :  { %35 = vadd.xlane.f32.xlu0 %v34_v2  ;;  %26 = vadd.xlane.f32.xlu1 %v25_v3  ;;  %v28_v8 = vsel %vm21_vm0, %v17_v6, 0.0  ;;  %v22_v9 = vsel %vm21_vm0, %v15_v7, 0.0  ;;  %v245_v43 = vld [vmem:[%s387_s2 + $0x10] sm:$0xff]  ;;  %v244_v44 = vld [vmem:[%s387_s2 + $0x8] sm:$0xff]  ;;  %v243_v45 = vld [vmem:[%s387_s2] sm:$0xff] }
   0x4   :  { %32 = vadd.xlane.f32.xlu2 %v31_v5  ;;  %248 = vmatpush.bf16.msra.mxu2 %v246_v42 }
   0x5   :  { %195 = vmatpush.bf16.msra.mxu0 %v246_v42  ;;  %247 = vmatpush.bf16.msra.mxu1 %v246_v42 }
   0x7   :  { %v258_v11 = vpop.eup %257 }
   0x8   :  { %v38_v12 = vmul.f32 64.0, %v258_v11  ;;  %vm42_vm1 = vweird.f32 %v258_v11  ;;  %250 = vmatpush.bf16.msra.mxu2 %v245_v43 }
   0x9   :  { %196 = vmatpush.bf16.msra.mxu0 %v245_v43  ;;  %249 = vmatpush.bf16.msra.mxu1 %v245_v43 }
   0xa   :  { %v39_v13 = vsub.f32 1.0, %v38_v12  ;;  %v256_v12 = vld [vmem:[%s386_s1] ss:$0 sm:$0xff] }
   0xb   :  { %29 = vadd.xlane.f32.xlu1 %v28_v8  ;;  %23 = vadd.xlane.f32.xlu0 %v22_v9 }
   0xc   :  { %v40_v14 = vmul.f32 %v258_v11, %v39_v13  ;;  %252 = vmatpush.bf16.msra.mxu2 %v244_v44 }
   0xd   :  { %197 = vmatpush.bf16.msra.mxu0 %v244_v44  ;;  %251 = vmatpush.bf16.msra.mxu1 %v244_v44 }
   0xe   :  { %v41_v15 = vadd.f32 %v258_v11, %v40_v14 }
  0x10   :  { %v310_v16 = vsel %vm42_vm1, %v258_v11, %v41_v15  ;;  %254 = vmatpush.bf16.msra.mxu2 %v243_v45 }
  0x11   :  { %198 = vmatpush.bf16.msra.mxu0 %v243_v45  ;;  %253 = vmatpush.bf16.msra.mxu1 %v243_v45 }
  0x76   :  { %v36_v17 = vpop.xlane.xlu0 %35  ;;  %v27_v18 = vpop.xlane.xlu1 %26 }
  0x77   :  { %v48_v19 = vmul.f32 %v310_v16, %v36_v17  ;;  %v45_v20 = vmul.f32 %v310_v16, %v27_v18  ;;  %v33_v25 = vpop.xlane.xlu2 %32 }
  0x78   :  { %v47_v32 = vmul.f32 %v310_v16, %v33_v25 }
  0x79   :  { %v314_v21 = vsub.f32 %v19_v0, %v48_v19  ;;  %v316_v22 = vsub.f32 %v16_v1, %v45_v20 }
  0x7a   :  { %v331_v35 = vsub.f32 %v18_v4, %v47_v32 }
  0x7b   :  { %v58_v23 = vmul.f32 %v314_v21, %v314_v21  ;;  %v55_v24 = vmul.f32 %v316_v22, %v316_v22 }
  0x7c   :  { %v57_v40 = vmul.f32 %v331_v35, %v331_v35 }
  0x7d   :  { %v71_v26 = vsel %vm21_vm0, %v58_v23, 0.0  ;;  %v62_v27 = vsel %vm21_vm0, %v55_v24, 0.0 }
  0x7e   :  { %72 = vadd.xlane.f32.xlu2 %v71_v26  ;;  %63 = vadd.xlane.f32.xlu1 %v62_v27  ;;  %v30_v28 = vpop.xlane.xlu1 %29  ;;  %v24_v29 = vpop.xlane.xlu0 %23  ;;  %v68_v41 = vsel %vm21_vm0, %v57_v40, 0.0 }
  0x7f   :  { %v46_v30 = vmul.f32 %v310_v16, %v30_v28  ;;  %v44_v31 = vmul.f32 %v310_v16, %v24_v29 }
  0x81   :  { %v327_v33 = vsub.f32 %v17_v6, %v46_v30  ;;  %v329_v34 = vsub.f32 %v15_v7, %v44_v31 }
  0x83   :  { %v56_v36 = vmul.f32 %v327_v33, %v327_v33  ;;  %v54_v37 = vmul.f32 %v329_v34, %v329_v34 }
  0x85   :  { %v65_v38 = vsel %vm21_vm0, %v56_v36, 0.0  ;;  %v59_v39 = vsel %vm21_vm0, %v54_v37, 0.0 }
  0x86   :  { %66 = vadd.xlane.f32.xlu2 %v65_v38  ;;  %60 = vadd.xlane.f32.xlu0 %v59_v39 }
  0x8e   :  { %69 = vadd.xlane.f32.xlu0 %v68_v41 }
  0xf1   :  { %v73_v46 = vpop.xlane.xlu2 %72  ;;  %v64_v47 = vpop.xlane.xlu1 %63 }
  0xf2   :  { %v78_v48 = vmul.f32 %v73_v46, %v310_v16  ;;  %v75_v49 = vmul.f32 %v64_v47, %v310_v16 }
  0xf4   :  { %v83_v50 = vadd.f32 1e-05, %v78_v48  ;;  %v80_v51 = vadd.f32 1e-05, %v75_v49 }
  0xf6   :  { %259 = vrsqrt.f32 %v83_v50  ;;  %vm130_vm3 = vweird.f32 %v83_v50  ;;  %vm100_vm5 = vweird.f32 %v80_v51 }
  0xf7   :  { %261 = vrsqrt.f32 %v80_v51 }
  0xf9   :  { %v67_v52 = vpop.xlane.xlu2 %66  ;;  %v61_v53 = vpop.xlane.xlu0 %60 }
  0xfa   :  { %v76_v54 = vmul.f32 %v67_v52, %v310_v16  ;;  %v74_v55 = vmul.f32 %v61_v53, %v310_v16 }
  0xfc   :  { %v260_v56 = vpop.eup %259  ;;  %v81_v57 = vadd.f32 1e-05, %v76_v54  ;;  %v79_v58 = vadd.f32 1e-05, %v74_v55 }
  0xfd   :  { %v262_v59 = vpop.eup %261  ;;  %v125_v60 = vmul.f32 %v260_v56, %v83_v50  ;;  %vm131_vm2 = vweird.f32 %v260_v56 }
  0xfe   :  { %v95_v61 = vmul.f32 %v262_v59, %v80_v51  ;;  %263 = vrsqrt.f32 %v81_v57  ;;  %vm132_vm4 = vmor %vm130_vm3, %vm131_vm2  ;;  %vm101_vm6 = vweird.f32 %v262_v59  ;;  %vm90_vm9 = vweird.f32 %v79_v58 }
  0xff   :  { %v126_v62 = vmul.f32 %v260_v56, %v125_v60  ;;  %265 = vrsqrt.f32 %v79_v58  ;;  %vm102_vm7 = vmor %vm100_vm5, %vm101_vm6  ;;  %vm110_vm10 = vweird.f32 %v81_v57  ;;  %vm214_vm2 = vcmask 785408  }
 0x100   :  { %v96_v63 = vmul.f32 %v262_v59, %v95_v61 }
 0x101   :  { %v127_v0 = vmul.f32 0.5, %v126_v62  ;;  %v70_v1 = vpop.xlane.xlu0 %69 }
 0x102   :  { %v97_v2 = vmul.f32 0.5, %v96_v63  ;;  %v77_v3 = vmul.f32 %v70_v1, %v310_v16 }
 0x103   :  { %v128_v4 = vsub.f32 1.5, %v127_v0 }
 0x104   :  { %v264_v5 = vpop.eup %263  ;;  %v98_v6 = vsub.f32 1.5, %v97_v2  ;;  %v82_v7 = vadd.f32 1e-05, %v77_v3 }
 0x105   :  { %v266_v8 = vpop.eup %265  ;;  %v129_v9 = vmul.f32 %v260_v56, %v128_v4  ;;  %v105_v10 = vmul.f32 %v264_v5, %v81_v57  ;;  %vm111_vm11 = vweird.f32 %v264_v5 }
 0x106   :  { %v85_v11 = vmul.f32 %v266_v8, %v79_v58  ;;  %267 = vrsqrt.f32 %v82_v7  ;;  %v99_v13 = vmul.f32 %v262_v59, %v98_v6  ;;  %vm91_vm8 = vweird.f32 %v266_v8  ;;  %vm112_vm13 = vmor %vm110_vm10, %vm111_vm11 }
 0x107   :  { %v106_v14 = vmul.f32 %v264_v5, %v105_v10  ;;  %v133_v15 = vsel %vm132_vm4, %v260_v56, %v129_v9  ;;  %vm92_vm12 = vmor %vm90_vm9, %vm91_vm8  ;;  %vm120_vm15 = vweird.f32 %v82_v7 }
 0x108   :  { %v86_v16 = vmul.f32 %v266_v8, %v85_v11  ;;  %v138_v17 = vmul.f32 %v133_v15, %v314_v21  ;;  %v103_v23 = vsel %vm102_vm7, %v262_v59, %v99_v13 }
 0x109   :  { %v107_v18 = vmul.f32 0.5, %v106_v14  ;;  %v135_v30 = vmul.f32 %v103_v23, %v316_v22 }
 0x10a   :  { %v87_v19 = vmul.f32 0.5, %v86_v16  ;;  %v146_v20 = vmul.f32 %v256_v12, %v138_v17 }
 0x10b   :  { %v108_v24 = vsub.f32 1.5, %v107_v18  ;;  %v143_v38 = vmul.f32 %v256_v12, %v135_v30 }
 0x10c   :  { %v268_v25 = vpop.eup %267  ;;  %v88_v26 = vsub.f32 1.5, %v87_v19  ;;  %v149_v27 = vpack.c.bf16 %v146_v20, %v146_v20 }
 0x10d   :  { %v115_v28 = vmul.f32 %v268_v25, %v82_v7  ;;  %v109_v31 = vmul.f32 %v264_v5, %v108_v24  ;;  %vm121_vm14 = vweird.f32 %v268_v25 }
 0x10e   :  { %v89_v29 = vmul.f32 %v266_v8, %v88_v26  ;;  %242 = vmatmul.msk.bf16.vlgmr.msra.gmra.mxu2 %vm21_vm0, %v149_v27  ;;  %vm122_vm1 = vmor %vm120_vm15, %vm121_vm14 }
 0x10f   :  { %v116_v21 = vmul.f32 %v268_v25, %v115_v28  ;;  %v113_v39 = vsel %vm112_vm13, %v264_v5, %v109_v31 }
 0x110   :  { %v93_v32 = vsel %vm92_vm12, %v266_v8, %v89_v29  ;;  %v136_v22 = vmul.f32 %v113_v39, %v327_v33 }
 0x111   :  { %v117_v36 = vmul.f32 0.5, %v116_v21  ;;  %v134_v37 = vmul.f32 %v93_v32, %v329_v34 }
 0x112   :  { %v144_v46 = vmul.f32 %v256_v12, %v136_v22 }
 0x113   :  { %v118_v40 = vsub.f32 1.5, %v117_v36  ;;  %v142_v41 = vmul.f32 %v256_v12, %v134_v37 }
 0x115   :  { %v119_v42 = vmul.f32 %v268_v25, %v118_v40  ;;  %v147_v43 = vpack.c.bf16 %v143_v38, %v142_v41 }
 0x117   :  { %v123_v44 = vsel %vm122_vm1, %v268_v25, %v119_v42  ;;  %240 = vmatmul.msk.bf16.vlgmr.msra.gmra.mxu0 %vm21_vm0, %v147_v43 }
 0x118   :  { %v137_v45 = vmul.f32 %v123_v44, %v331_v35 }
 0x11a   :  { %v145_v47 = vmul.f32 %v256_v12, %v137_v45 }
 0x11c   :  { %v148_v34 = vpack.c.bf16 %v145_v47, %v144_v46 }
 0x11e   :  { %241 = vmatmul.msk.bf16.vlgmr.msra.gmra.mxu1 %vm21_vm0, %v148_v34 }
 0x191   :  { %v210_v48 = vpop.f32.mrf.mxu2 }
 0x192   :  { %219 = vst.msk [vmem:[%s388_s3 + $0x20] sm:$0xff] %vm214_vm2, %v210_v48 }
 0x194   :  { %v200_v49 = vpop.f32.mrf.mxu0 }
 0x195   :  { %215 = vst.msk [vmem:[%s388_s3] sm:$0xff] %vm214_vm2, %v200_v49 }
 0x199   :  { %v212_v33 = vpop.f32.mrf.mxu2 }
 0x19b   :  { %v205_v50 = vpop.f32.mrf.mxu1 }
 0x19c   :  { %v202_v51 = vpop.f32.mrf.mxu0  ;;  %217 = vst.msk [vmem:[%s388_s3 + $0x10] sm:$0xff] %vm214_vm2, %v205_v50 }
 0x19d   :  { %216 = vst.msk [vmem:[%s388_s3 + $0x8] sm:$0xff] %vm214_vm2, %v202_v51 }
 0x1a3   :  { %v207_v35 = vpop.f32.mrf.mxu1 }
 0x1a4   :  { %218 = vst.msk [vmem:[%s388_s3 + $0x18] sm:$0xff] %vm214_vm2, %v207_v35 }

// kernel: prior_network_forward.12
= control target key start
LH: loop header
LB: loop body
LE: loop exit
PB: predicated region body
PF: predicated region fallthrough
CT: control target
= control target key end

     0   :  { %s209_s1 = inlined_call_operand.vmem [shape: bf16[128,128], index: 1, kind: input, shape index: {}]   ;;  %s210_s2 = inlined_call_operand.vmem [shape: f32[1,128], index: 2, kind: input, shape index: {}]   ;;  %s211_s0 = inlined_call_operand.vmem [shape: f32[8,128], index: 0, kind: input, shape index: {}]   ;;  %s212_s3 = inlined_call_operand.vmem [shape: f32[8,128], index: 3, kind: output, shape index: {}]  }
   0x1   :  { %v154_v0 = vld [vmem:[%s209_s1 + $0x38] sm:$0xff]  ;;  %v153_v1 = vld [vmem:[%s209_s1 + $0x30] sm:$0xff]  ;;  %v152_v2 = vld [vmem:[%s209_s1 + $0x28] sm:$0xff] }
   0x2   :  { %86 = vmatpush.bf16.msra.mxu0 %v154_v0  ;;  %v151_v3 = vld [vmem:[%s209_s1 + $0x20] sm:$0xff]  ;;  %v150_v4 = vld [vmem:[%s209_s1 + $0x18] sm:$0xff]  ;;  %v149_v5 = vld [vmem:[%s209_s1 + $0x10] sm:$0xff] }
   0x3   :  { %v148_v6 = vld [vmem:[%s209_s1 + $0x8] sm:$0xff]  ;;  %v147_v7 = vld [vmem:[%s209_s1] sm:$0xff] }
   0x4   :  { %v20_v8 = vld [vmem:[%s211_s0] sm:$0xff] }
   0x5   :  { %v21_v9 = vpack.c.bf16 %v20_v8, %v20_v8  ;;  %v155_v10 = vld [vmem:[%s210_s2] ss:$0 sm:$0xff] }
   0x6   :  { %87 = vmatpush.bf16.msra.mxu0 %v153_v1 }
   0xa   :  { %88 = vmatpush.bf16.msra.mxu0 %v152_v2 }
   0xe   :  { %89 = vmatpush.bf16.msra.mxu0 %v151_v3 }
  0x12   :  { %90 = vmatpush.bf16.msra.mxu0 %v150_v4 }
  0x16   :  { %91 = vmatpush.bf16.msra.mxu0 %v149_v5 }
  0x1a   :  { %92 = vmatpush.bf16.msra.mxu0 %v148_v6 }
  0x1e   :  { %93 = vmatpush.bf16.msra.mxu0 %v147_v7 }
  0x21   :  { %94 = vmatmul.bf16.vlgmr.msra.gmra.mxu0 %v21_v9 }
  0x9e   :  { %v95_v11 = vpop.f32.mrf.mxu0 }
  0x9f   :  { %v109_v12 = vadd.f32 %v155_v10, %v95_v11 }
  0xa1   :  { %110 = vst [vmem:[%s212_s3] sm:$0xff] %v109_v12 }
  0xa6   :  { %v97_v13 = vpop.f32.mrf.mxu0 }

// kernel: prior_network_forward.16
= control target key start
LH: loop header
LB: loop body
LE: loop exit
PB: predicated region body
PF: predicated region fallthrough
CT: control target
= control target key end

     0   :  { %s854_s15 = smov 0   ;;  %s856_s16 = smov 0   ;;  %s1024_s0 = inlined_call_operand.vmem [shape: f32[2,4,17,16], index: 0, kind: input, shape index: {}]   ;;  %s1025_s1 = inlined_call_operand.vmem [shape: f32[2,18,16], index: 1, kind: input, shape index: {}]   ;;  %s1026_s2 = inlined_call_operand.vmem [shape: f32[2,18,16], index: 2, kind: input, shape index: {}]   ;;  %s1027_s3 = inlined_call_operand.vmem [shape: f32[4,17,18], index: 3, kind: input, shape index: {}]   ;;  %s1028_s4 = inlined_call_operand.vmem [shape: f32[2,4,17,16], index: 4, kind: output, shape index: {}]  }
   0x1   :  { %s858_s17 = smov 0   ;;  %s860_s18 = smov 0  }
   0x2   :  { %s862_s19 = smov 0  }
   0x3 LB: > { %s23_s20 = sadd.s32 1, %s819_s17  ;;  %s26_s21 = sadd.s32 1, %s823_s18  ;;  %s827_s19 = sphi %s862_s19, %s14_s19   ;;  %s823_s18 = sphi %s860_s18, %s1036_s18   ;;  %s819_s17 = sphi %s858_s17, %s1035_s17   ;;  %s815_s16 = sphi %s856_s16, %s1034_s16   ;;  %s811_s15 = sphi %s854_s15, %s1033_s15  }
   0x4   : > { %p24_p0 = scmp.ge.s32.totalorder %s23_s20, 4  ;;  %p705_p1 = scmp.ge.s32.totalorder %s827_s19, 1 }
   0x5   : > { %p212_p2 = scmp.lt.s32.totalorder %s827_s19, 9 }
   0x6   : > { %s1038_s20 = smov (%p24_p0, %s23_s20), 0  ;;  %s1040_s21 = smov (!%p24_p0, %s26_s21), %s823_s18 }
   0x7   : > { %p213_p3 = pnand %p705_p1, %p212_p2  ;;  %p28_p4 = scmp.ge.s32.totalorder %s1040_s21, 2 }
   0x8   : > { %p261_p5 = scmp.lt.s32.totalorder (!%p213_p3), %s815_s16, 1  ;;  %p263_p6 = scmp.lt.s32.totalorder (!%p213_p3), %s811_s15, 3 }
   0x9   : > { %s1042_s21 = smov (%p28_p4, %s1040_s21), 0  ;;  %216 = sbr.rel (%p213_p3) target bundleno = 721 (0x2d1), region = 36 }
   0xe   : > { %s1044_s16 = smov (!%p261_p5, %s815_s16), 1  ;;  %s1046_s15 = smov (!%p263_p6, %s811_s15), 3  ;;  %vm365_vm0 = vcmask 123904   ;;  %vm309_vm1 = vcmask 130048   ;;  %vm316_vm2 = vcmask 122880  }
   0xf   : > { %s723_s22 = smul.u32 24, %s1044_s16 }
  0x10   : > { %s721_s23 = smul.u32 3, %s1046_s15 }
  0x11   : > { %s274_s26 = scalar_lea.vmem %s1025_s1, %s723_s22  ;;  %s722_s27 = smul.u32 12, %s1044_s16 }
  0x12   : > { %v896_v0 = vld [vmem:[%s274_s26 + $0x10] sm:$0x3]  ;;  %v898_v1 = vld [vmem:[%s274_s26 + $0x8] sm:$0xff]  ;;  %v907_v4 = vld [vmem:[%s274_s26] sm:$0xff]  ;;  %s724_s7 = smul.u32 24, %s1046_s15  ;;  %s279_s13 = scalar_lea.vmem %s1026_s2, %s723_s22 }
  0x13   : > { %v358_v2 = vmul.f32 %v896_v0, %v896_v0  ;;  %v357_v3 = vmul.f32 %v898_v1, %v898_v1  ;;  %s904_s28 = sadd.s32 %s722_s27, %s721_s23  ;;  %v356_v10 = vmul.f32 %v907_v4, %v907_v4 }
  0x14   : > { %s706_s29 = sshll.u32 %s904_s28, 3  ;;  %s284_s10 = scalar_lea.vmem %s1027_s3, %s724_s7 }
  0x15   : > { %v366_v5 = vsel %vm365_vm0, %v358_v2, 0.0  ;;  %v362_v6 = vsel %vm309_vm1, %v357_v3, 0.0  ;;  %s269_s6 = scalar_lea.vmem %s1024_s0, %s706_s29  ;;  %v359_v14 = vsel %vm309_vm1, %v356_v10, 0.0  ;;  %s293_s16 = scalar_lea.vmem %s1028_s4, %s706_s29 }
  0x16   : > { %367 = vadd.xlane.f32.xlu0 %v366_v5  ;;  %363 = vadd.xlane.f32.xlu1 %v362_v6  ;;  %v915_v7 = vld [vmem:[%s269_s6] sm:$0xff]  ;;  %v917_v8 = vld [vmem:[%s269_s6 + $0x10] sm:$0x1]  ;;  %v925_v12 = vld [vmem:[%s269_s6 + $0x8] sm:$0xff] }
  0x17   : > { %v306_v9 = vmul.f32 %v915_v7, %v915_v7  ;;  %v308_v11 = vmul.f32 %v917_v8, %v917_v8  ;;  %v307_v16 = vmul.f32 %v925_v12, %v925_v12 }
  0x19   : > { %v310_v13 = vsel %vm309_vm1, %v306_v9, 0.0  ;;  %v317_v15 = vsel %vm316_vm2, %v308_v11, 0.0  ;;  %v313_v17 = vsel %vm309_vm1, %v307_v16, 0.0 }
  0x1a   : > { %311 = vadd.xlane.f32.xlu2 %v310_v13 }
  0x1e   : > { %360 = vadd.xlane.f32.xlu0 %v359_v14  ;;  %318 = vadd.xlane.f32.xlu1 %v317_v15 }
  0x22   : > { %314 = vadd.xlane.f32.xlu2 %v313_v17 }
  0x89   : > { %v368_v18 = vpop.xlane.xlu0 %367  ;;  %v364_v19 = vpop.xlane.xlu1 %363 }
  0x8a   : > { %v371_v20 = vadd.f32 1e-12, %v368_v18  ;;  %v370_v21 = vadd.f32 1e-12, %v364_v19 }
  0x8c   : > { %765 = vrsqrt.f32 %v371_v20  ;;  %vm398_vm4 = vweird.f32 %v371_v20  ;;  %vm388_vm6 = vweird.f32 %v370_v21 }
  0x8d   : > { %767 = vrsqrt.f32 %v370_v21  ;;  %v312_v22 = vpop.xlane.xlu2 %311 }
  0x8e   : > { %v933_v23 = vadd.f32 1e-12, %v312_v22 }
  0x90   : > { %769 = vrsqrt.f32 %v933_v23  ;;  %vm329_vm0 = vweird.f32 %v933_v23 }
  0x91   : > { %v361_v24 = vpop.xlane.xlu0 %360  ;;  %v319_v25 = vpop.xlane.xlu1 %318 }
  0x92   : > { %v766_v26 = vpop.eup %765  ;;  %v369_v27 = vadd.f32 1e-12, %v361_v24  ;;  %v936_v28 = vadd.f32 1e-12, %v319_v25  ;;  %v448_v24 = vlaneseq }
  0x93   : > { %v768_v29 = vpop.eup %767  ;;  %v393_v30 = vmul.f32 %v766_v26, %v371_v20  ;;  %vm399_vm3 = vweird.f32 %v766_v26 }
  0x94   : > { %v383_v31 = vmul.f32 %v768_v29, %v370_v21  ;;  %771 = vrsqrt.f32 %v369_v27  ;;  %vm400_vm5 = vmor %vm398_vm4, %vm399_vm3  ;;  %vm389_vm7 = vweird.f32 %v768_v29  ;;  %vm378_vm10 = vweird.f32 %v369_v27 }
  0x95   : > { %v394_v32 = vmul.f32 %v766_v26, %v393_v30  ;;  %773 = vrsqrt.f32 %v936_v28  ;;  %v315_v33 = vpop.xlane.xlu2 %314  ;;  %vm946_vm9 = vmor %vm388_vm6, %vm389_vm7  ;;  %vm349_vm12 = vweird.f32 %v936_v28  ;;  %v449_v25 = vshrl.u32 %v448_v24, 7 }
  0x96   : > { %v939_v34 = vpop.eup %769  ;;  %v384_v35 = vmul.f32 %v768_v29, %v383_v31  ;;  %v321_v36 = vadd.f32 1e-12, %v315_v33 }
  0x97   : > { %v395_v37 = vmul.f32 0.5, %v394_v32  ;;  %v324_v38 = vmul.f32 %v939_v34, %v933_v23  ;;  %vm330_vm3 = vweird.f32 %v939_v34 }
  0x98   : > { %v385_v39 = vmul.f32 0.5, %v384_v35  ;;  %775 = vrsqrt.f32 %v321_v36  ;;  %vm339_vm14 = vweird.f32 %v321_v36  ;;  %vm331_vm6 = vmor %vm329_vm0, %vm330_vm3 }
  0x99   : > { %v396_v40 = vsub.f32 1.5, %v395_v37  ;;  %v325_v44 = vmul.f32 %v939_v34, %v324_v38 }
  0x9a   : > { %v772_v41 = vpop.eup %771  ;;  %v386_v43 = vsub.f32 1.5, %v385_v39  ;;  %v443_v39 = vld [vmem:[%s284_s10 + $0x8] sm:$0xff] }
  0x9b   : > { %v774_v42 = vpop.eup %773  ;;  %v373_v45 = vmul.f32 %v772_v41, %v369_v27  ;;  %v397_v46 = vmul.f32 %v766_v26, %v396_v40  ;;  %v326_v53 = vmul.f32 0.5, %v325_v44  ;;  %vm379_vm8 = vweird.f32 %v772_v41 }
  0x9c   : > { %v344_v47 = vmul.f32 %v774_v42, %v936_v28  ;;  %v387_v56 = vmul.f32 %v768_v29, %v386_v43  ;;  %vm380_vm11 = vmor %vm378_vm10, %vm379_vm8  ;;  %vm350_vm13 = vweird.f32 %v774_v42  ;;  %v454_v27 = vadd.s32 1, %v449_v25  ;;  %v442_v28 = vld [vmem:[%s284_s10] sm:$0xff] }
  0x9d   : > { %v374_v48 = vmul.f32 %v772_v41, %v373_v45  ;;  %v401_v49 = vsel %vm400_vm5, %v766_v26, %v397_v46  ;;  %v327_v2 = vsub.f32 1.5, %v326_v53  ;;  %vm351_vm4 = vmor %vm349_vm12, %vm350_vm13  ;;  %v453_v26 = vand.u32 127, %v448_v24 }
  0x9e   : > { %v776_v50 = vpop.eup %775  ;;  %v345_v51 = vmul.f32 %v774_v42, %v344_v47  ;;  %v404_v52 = vmul.f32 %v401_v49, %v896_v0  ;;  %v391_v5 = vsel %vm946_vm9, %v768_v29, %v387_v56  ;;  %vm463_vm8 = vcmask 146432  }
  0x9f   : > { %v375_v54 = vmul.f32 0.5, %v374_v48  ;;  %v334_v55 = vmul.f32 %v776_v50, %v321_v36  ;;  %vm340_vm15 = vweird.f32 %v776_v50  ;;  %v403_v13 = vmul.f32 %v391_v5, %v898_v1  ;;  %v302_v5 = vld [vmem:[%s279_s13 + $0x8] sm:$0xff] }
  0xa0   : > { %v346_v57 = vmul.f32 0.5, %v345_v51  ;;  %v408_v58 = vpack.c.bf16 %v404_v52, %v404_v52  ;;  %v328_v14 = vmul.f32 %v939_v34, %v327_v2  ;;  %vm341_vm5 = vmor %vm339_vm14, %vm340_vm15  ;;  %vm457_vm7 = vcmp.gt.s32.totalorder %v453_v26, %v454_v27 }
  0xa1   : > { %v376_v59 = vsub.f32 1.5, %v375_v54  ;;  %v335_v60 = vmul.f32 %v776_v50, %v334_v55  ;;  %vm470_vm10 = vcmask 139264   ;;  %vm545_vm12 = vcmask 1040384  }
  0xa2   : > { %v347_v62 = vsub.f32 1.5, %v346_v57  ;;  %v419_v63 = vsel %vm309_vm1, %v408_v58, 0  ;;  %v332_v1 = vsel %vm331_vm6, %v939_v34, %v328_v14  ;;  %v444_v34 = vld [vmem:[%s284_s10 + $0x10] sm:$0x1] }
  0xa3   : > { %v336_v3 = vmul.f32 0.5, %v335_v60  ;;  %427 = vmatpush.bf16.xpose.msra.mxu0 %v419_v63  ;;  %717 = vmatpush.bf16.xpose.msra.mxu2 %v419_v63  ;;  %v377_v0 = vmul.f32 %v772_v41, %v376_v59  ;;  %v353_v21 = vmul.f32 %v332_v1, %v915_v7  ;;  %v450_v7 = vadd.s32 8, %v449_v25  ;;  %v303_v63 = vld [vmem:[%s279_s13 + $0x10] sm:$0x3] }
  0xa4   : > { %v348_v10 = vmul.f32 %v774_v42, %v347_v62  ;;  %v305_v2 = vpack.c.bf16 %v303_v63, %v303_v63 }
  0xa5   : > { %v337_v6 = vsub.f32 1.5, %v336_v3  ;;  %v381_v9 = vsel %vm380_vm11, %v772_v41, %v377_v0  ;;  %v455_v36 = vadd.s32 1, %v450_v7  ;;  %v301_v0 = vld [vmem:[%s279_s13] sm:$0xff] }
  0xa6   : > { %v402_v11 = vmul.f32 %v381_v9, %v907_v4  ;;  %v352_v18 = vsel %vm351_vm4, %v774_v42, %v348_v10  ;;  %v547_v3 = vsel %vm545_vm12, %v305_v2, 0 }
  0xa7   : > { %v338_v15 = vmul.f32 %v776_v50, %v337_v6  ;;  %v355_v20 = vmul.f32 %v352_v18, %v917_v8  ;;  %v451_v8 = vadd.s32 16, %v449_v25  ;;  %vm458_vm11 = vcmp.gt.s32.totalorder %v453_v26, %v455_v36  ;;  %719 = vmatpush.bf16.msra.mxu3 %v547_v3  ;;  %555 = vmatpush.bf16.msra.mxu1 %v547_v3 }
  0xa8   : > { %v407_v16 = vpack.c.bf16 %v403_v13, %v402_v11  ;;  %v304_v6 = vpack.c.bf16 %v302_v5, %v301_v0 }
  0xa9   : > { %v342_v17 = vsel %vm341_vm5, %v776_v50, %v338_v15  ;;  %v406_v23 = vpack.c.bf16 %v355_v20, %v355_v20  ;;  %v456_v31 = vadd.s32 1, %v451_v8 }
  0xaa   : > { %v416_v19 = vsel %vm309_vm1, %v407_v16, 0  ;;  %v354_v4 = vmul.f32 %v342_v17, %v925_v12 }
  0xab   : > { %428 = vmatpush.bf16.xpose.msra.mxu0 %v416_v19  ;;  %718 = vmatpush.bf16.xpose.msra.mxu2 %v416_v19  ;;  %vm459_vm9 = vcmp.gt.s32.totalorder %v453_v26, %v456_v31 }
  0xac   : > { %v405_v22 = vpack.c.bf16 %v354_v4, %v353_v21  ;;  %720 = vmatpush.bf16.msra.mxu3 %v304_v6  ;;  %556 = vmatpush.bf16.msra.mxu1 %v304_v6 }
  0xb2   : > { %711 = vmatmul.msk.bf16.vlgmr.msra.gmra.mxu0 %vm309_vm1, %v405_v22  ;;  %712 = vmatmul.msk.bf16.vlgmr.msra.gmra.mxu2 %vm309_vm1, %v406_v23 }
 0x12f   : > { %v430_v12 = vpop.f32.mrf.mxu0 }
 0x130   : > { %v439_v29 = vmul.f32 16.0, %v430_v12 }
 0x132   : > { %v445_v30 = vadd.f32 %v442_v28, %v439_v29 }
 0x134   : > { %v460_v32 = vsel %vm457_vm7, -3.4028235e+38, %v445_v30 }
 0x135   : > { %v435_v33 = vpop.f32.mrf.mxu2  ;;  %v464_v35 = vsel %vm463_vm8, %v460_v32, -inf }
 0x136   : > { %v441_v37 = vmul.f32 16.0, %v435_v33  ;;  %465 = vmax.xlane.f32.xlu1 %v464_v35 }
 0x137   : > { %v432_v38 = vpop.f32.mrf.mxu0 }
 0x138   : > { %v447_v40 = vadd.f32 %v444_v34, %v441_v37  ;;  %v440_v41 = vmul.f32 16.0, %v432_v38 }
 0x13a   : > { %v446_v42 = vadd.f32 %v443_v39, %v440_v41  ;;  %v462_v43 = vsel %vm459_vm9, -3.4028235e+38, %v447_v40 }
 0x13b   : > { %v471_v44 = vsel %vm470_vm10, %v462_v43, -inf }
 0x13c   : > { %472 = vmax.xlane.f32.xlu0 %v471_v44  ;;  %v461_v45 = vsel %vm458_vm11, -3.4028235e+38, %v446_v42 }
 0x13d   : > { %v437_v46 = vpop.f32.mrf.mxu2  ;;  %v467_v47 = vsel %vm463_vm8, %v461_v45, -inf }
 0x13e   : > { %468 = vmax.xlane.f32.xlu2 %v467_v47 }
 0x1a9   : > { %v466_v48 = vpop.xlane.xlu1 %465 }
 0x1aa   : > { %v474_v49 = vsub.f32 %v460_v32, %v466_v48 }
 0x1ac   : > { %v477_v50 = vmul.f32 1.442695, %v474_v49 }
 0x1ae   : > { %777 = vpow2.f32 %v477_v50 }
 0x1af   : > { %v473_v51 = vpop.xlane.xlu0 %472 }
 0x1b0   : > { %v476_v52 = vsub.f32 %v462_v43, %v473_v51 }
 0x1b1   : > { %v469_v53 = vpop.xlane.xlu2 %468 }
 0x1b2   : > { %v481_v54 = vmul.f32 1.442695, %v476_v52  ;;  %v475_v55 = vsub.f32 %v461_v45, %v469_v53 }
 0x1b4   : > { %v973_v56 = vpop.eup %777  ;;  %779 = vpow2.f32 %v481_v54  ;;  %v479_v57 = vmul.f32 1.442695, %v475_v55 }
 0x1b5   : > { %v483_v58 = vsel %vm463_vm8, %v973_v56, 0.0 }
 0x1b6   : > { %781 = vpow2.f32 %v479_v57  ;;  %484 = vadd.xlane.f32.xlu1 %v483_v58 }
 0x1ba   : > { %v977_v59 = vpop.eup %779 }
 0x1bb   : > { %v489_v60 = vsel %vm470_vm10, %v977_v59, 0.0 }
 0x1bc   : > { %v981_v61 = vpop.eup %781  ;;  %490 = vadd.xlane.f32.xlu0 %v489_v60 }
 0x1bd   : > { %v486_v62 = vsel %vm463_vm8, %v981_v61, 0.0 }
 0x1be   : > { %487 = vadd.xlane.f32.xlu2 %v486_v62 }
 0x229   : > { %v485_v9 = vpop.xlane.xlu1 %484 }
 0x22a   : > { %783 = vrcp.f32 %v485_v9  ;;  %vm497_vm14 = vweird.f32 %v485_v9  ;;  %v501_v21 = vand.u32 2147483647, %v485_v9  ;;  %v503_v22 = vand.u32 2147483648, %v485_v9 }
 0x22c   : > { %vm502_vm5 = vcmp.eq.f32.partialorder %v501_v21, 8.507059e+37  ;;  %v504_v30 = vor.u32 1.1754944e-38, %v503_v22 }
 0x22f   : > { %v491_v10 = vpop.xlane.xlu0 %490 }
 0x230   : > { %v784_v11 = vpop.eup %783  ;;  %785 = vrcp.f32 %v491_v10  ;;  %v533_v23 = vand.u32 2147483648, %v491_v10  ;;  %v531_v25 = vand.u32 2147483647, %v491_v10  ;;  %vm527_vm3 = vweird.f32 %v491_v10 }
 0x231   : > { %v493_v13 = vmul.f32 %v784_v11, %v485_v9  ;;  %v488_v14 = vpop.xlane.xlu2 %487  ;;  %vm498_vm13 = vweird.f32 %v784_v11 }
 0x232   : > { %787 = vrcp.f32 %v488_v14  ;;  %vm990_vm0 = vmor %vm497_vm14, %vm498_vm13  ;;  %v516_v12 = vand.u32 2147483647, %v488_v14  ;;  %v518_v28 = vand.u32 2147483648, %v488_v14  ;;  %v534_v31 = vor.u32 1.1754944e-38, %v533_v23 }
 0x233   : > { %v494_v15 = vsub.f32 1.0, %v493_v13  ;;  %vm532_vm7 = vcmp.eq.f32.partialorder %v531_v25, 8.507059e+37  ;;  %vm512_vm9 = vweird.f32 %v488_v14 }
 0x234   : > { %v519_v34 = vor.u32 1.1754944e-38, %v518_v28  ;;  %vm517_vm11 = vcmp.eq.f32.partialorder %v516_v12, 8.507059e+37 }
 0x235   : > { %v495_v16 = vmul.f32 %v784_v11, %v494_v15 }
 0x236   : > { %v786_v17 = vpop.eup %785 }
 0x237   : > { %v523_v18 = vmul.f32 %v786_v17, %v491_v10  ;;  %v496_v1 = vadd.f32 %v784_v11, %v495_v16  ;;  %vm528_vm15 = vweird.f32 %v786_v17 }
 0x238   : > { %v788_v19 = vpop.eup %787  ;;  %vm529_vm6 = vmor %vm527_vm3, %vm528_vm15 }
 0x239   : > { %v524_v4 = vsub.f32 1.0, %v523_v18  ;;  %v508_v20 = vmul.f32 %v788_v19, %v488_v14  ;;  %v500_v8 = vsel %vm990_vm0, %v784_v11, %v496_v1  ;;  %vm513_vm4 = vweird.f32 %v788_v19 }
 0x23a   : > { %vm514_vm10 = vmor %vm512_vm9, %vm513_vm4  ;;  %v505_v36 = vsel %vm502_vm5, %v504_v30, %v500_v8 }
 0x23b   : > { %v525_v24 = vmul.f32 %v786_v17, %v524_v4  ;;  %v509_v26 = vsub.f32 1.0, %v508_v20  ;;  %v506_v41 = vmul.f32 %v973_v56, %v505_v36 }
 0x23d   : > { %v526_v29 = vadd.f32 %v786_v17, %v525_v24  ;;  %v510_v7 = vmul.f32 %v788_v19, %v509_v26 }
 0x23f   : > { %v511_v32 = vadd.f32 %v788_v19, %v510_v7  ;;  %v530_v33 = vsel %vm529_vm6, %v786_v17, %v526_v29 }
 0x240   : > { %v535_v35 = vsel %vm532_vm7, %v534_v31, %v530_v33 }
 0x241   : > { %v515_v37 = vsel %vm514_vm10, %v788_v19, %v511_v32  ;;  %v536_v38 = vmul.f32 %v977_v59, %v535_v35 }
 0x242   : > { %v520_v39 = vsel %vm517_vm11, %v519_v34, %v515_v37 }
 0x243   : > { %v538_v40 = vpack.c.bf16 %v536_v38, %v536_v38  ;;  %v521_v42 = vmul.f32 %v981_v61, %v520_v39 }
 0x245   : > { %714 = vmatmul.msk.bf16.vlgmr.msra.gmra.mxu3 %vm463_vm8, %v538_v40  ;;  %v537_v43 = vpack.c.bf16 %v521_v42, %v506_v41 }
 0x247   : > { %713 = vmatmul.msk.bf16.vlgmr.msra.gmra.mxu1 %vm463_vm8, %v537_v43 }
 0x2c4   : > { %v558_v44 = vpop.f32.mrf.mxu1 }
 0x2c5   : > { %567 = vst.msk [vmem:[%s293_s16] sm:$0xff] %vm309_vm1, %v558_v44 }
 0x2c8   : > { %v563_v45 = vpop.f32.mrf.mxu3 }
 0x2c9   : > { %569 = vst.msk [vmem:[%s293_s16 + $0x10] sm:$0x1] %vm316_vm2, %v563_v45 }
 0x2cc   : > { %v560_v46 = vpop.f32.mrf.mxu1 }
 0x2cd   : > { %568 = vst.msk [vmem:[%s293_s16 + $0x8] sm:$0xff] %vm309_vm1, %v560_v46 }
 0x2d0   : > { %v565_v47 = vpop.f32.mrf.mxu3 }
 0x2d1 PF: > { %s14_s19 = sadd.s32 1, %s827_s19   ;;  %s1033_s15 = smov %s819_s17 }
 0x2d2   : > { %p11_p7 = scmp.ge.s32.totalorder %s14_s19, 10   ;;  %s1034_s16 = smov %s823_s18 }
 0x2d3   : > { %s1035_s17 = smov %s1038_s20  ;;  %s1036_s18 = smov %s1042_s21 }
 0x2d4   :  { %13 = sbr.rel (!%p11_p7) target bundleno = 3 (0x3), region = 75 }

// kernel: prior_network_forward.17
= control target key start
LH: loop header
LB: loop body
LE: loop exit
PB: predicated region body
PF: predicated region fallthrough
CT: control target
= control target key end

     0   :  { %vm58_vm0 = vcmask 523264   ;;  %v281_v23 = vmov 64.0   ;;  %s410_s2 = inlined_call_operand.vmem [shape: bf16[64,64], index: 2, kind: input, shape index: {}]   ;;  %s411_s0 = inlined_call_operand.vmem [shape: f32[40,64], index: 0, kind: input, shape index: {}]   ;;  %s412_s3 = inlined_call_operand.vmem [shape: f32[1,64], index: 3, kind: input, shape index: {}]   ;;  %s413_s1 = inlined_call_operand.vmem [shape: f32[40,64], index: 1, kind: input, shape index: {}]   ;;  %s414_s4 = inlined_call_operand.vmem [shape: f32[40,64], index: 4, kind: output, shape index: {}]  }
   0x1   :  { %v258_v0 = vld [vmem:[%s410_s2 + $0x18] sm:$0xff]  ;;  %v257_v1 = vld [vmem:[%s410_s2 + $0x10] sm:$0xff]  ;;  %v256_v2 = vld [vmem:[%s410_s2 + $0x8] sm:$0xff]  ;;  %269 = vrcp.f32 %v281_v23 }
   0x2   :  { %72 = vmatpush.bf16.msra.mxu0 %v258_v0  ;;  %259 = vmatpush.bf16.msra.mxu1 %v258_v0  ;;  %v255_v3 = vld [vmem:[%s410_s2] sm:$0xff]  ;;  %v19_v5 = vld [vmem:[%s411_s0 + $0x8] sm:$0xff]  ;;  %v20_v6 = vld [vmem:[%s411_s0 + $0x10] sm:$0xff] }
   0x3   :  { %260 = vmatpush.bf16.msra.mxu2 %v258_v0  ;;  %v18_v4 = vld [vmem:[%s411_s0] sm:$0xff]  ;;  %v21_v7 = vld [vmem:[%s411_s0 + $0x18] sm:$0xff] }
   0x4   :  { %v22_v8 = vld [vmem:[%s411_s0 + $0x20] sm:$0xff]  ;;  %v23_v9 = vpack.c.bf16 %v19_v5, %v18_v4  ;;  %v24_v10 = vpack.c.bf16 %v21_v7, %v20_v6 }
   0x5   :  { %v25_v11 = vpack.c.bf16 %v22_v8, %v22_v8 }
   0x6   :  { %73 = vmatpush.bf16.msra.mxu0 %v257_v1  ;;  %261 = vmatpush.bf16.msra.mxu1 %v257_v1 }
   0x7   :  { %262 = vmatpush.bf16.msra.mxu2 %v257_v1  ;;  %v270_v24 = vpop.eup %269 }
   0x8   :  { %v108_v25 = vmul.f32 64.0, %v270_v24  ;;  %vm112_vm1 = vweird.f32 %v270_v24 }
   0xa   :  { %74 = vmatpush.bf16.msra.mxu0 %v256_v2  ;;  %263 = vmatpush.bf16.msra.mxu1 %v256_v2  ;;  %v109_v26 = vsub.f32 1.0, %v108_v25 }
   0xb   :  { %264 = vmatpush.bf16.msra.mxu2 %v256_v2 }
   0xc   :  { %v110_v27 = vmul.f32 %v270_v24, %v109_v26 }
   0xe   :  { %75 = vmatpush.bf16.msra.mxu0 %v255_v3  ;;  %265 = vmatpush.bf16.msra.mxu1 %v255_v3  ;;  %v111_v28 = vadd.f32 %v270_v24, %v110_v27 }
   0xf   :  { %266 = vmatpush.bf16.msra.mxu2 %v255_v3 }
  0x10   :  { %v113_v29 = vsel %vm112_vm1, %v270_v24, %v111_v28  ;;  %v219_v28 = vld [vmem:[%s413_s1 + $0x10] sm:$0xff] }
  0x11   :  { %252 = vmatmul.msk.bf16.vlgmr.msra.gmra.mxu0 %vm58_vm0, %v23_v9  ;;  %253 = vmatmul.msk.bf16.vlgmr.msra.gmra.mxu1 %vm58_vm0, %v24_v10 }
  0x12   :  { %254 = vmatmul.msk.bf16.vlgmr.msra.gmra.mxu2 %vm58_vm0, %v25_v11 }
  0x8e   :  { %v77_v12 = vpop.f32.mrf.mxu0  ;;  %v82_v13 = vpop.f32.mrf.mxu1 }
  0x8f   :  { %v98_v14 = vsel %vm58_vm0, %v82_v13, 0.0  ;;  %v92_v15 = vsel %vm58_vm0, %v77_v12, 0.0 }
  0x90   :  { %99 = vadd.xlane.f32.xlu1 %v98_v14  ;;  %93 = vadd.xlane.f32.xlu0 %v92_v15 }
  0x95   :  { %v87_v16 = vpop.f32.mrf.mxu2 }
  0x96   :  { %v104_v17 = vsel %vm58_vm0, %v87_v16, 0.0  ;;  %v79_v18 = vpop.f32.mrf.mxu0  ;;  %v84_v19 = vpop.f32.mrf.mxu1 }
  0x97   :  { %105 = vadd.xlane.f32.xlu2 %v104_v17  ;;  %v101_v20 = vsel %vm58_vm0, %v84_v19, 0.0  ;;  %v95_v21 = vsel %vm58_vm0, %v79_v18, 0.0 }
  0x98   :  { %102 = vadd.xlane.f32.xlu1 %v101_v20  ;;  %96 = vadd.xlane.f32.xlu0 %v95_v21  ;;  %v268_v20 = vld [vmem:[%s412_s3] ss:$0 sm:$0xff] }
  0x9d   :  { %v89_v22 = vpop.f32.mrf.mxu2 }
 0x103   :  { %v100_v30 = vpop.xlane.xlu1 %99  ;;  %v94_v31 = vpop.xlane.xlu0 %93 }
 0x104   :  { %v116_v32 = vmul.f32 %v113_v29, %v100_v30  ;;  %v114_v33 = vmul.f32 %v113_v29, %v94_v31 }
 0x106   :  { %v342_v34 = vsub.f32 %v82_v13, %v116_v32  ;;  %v344_v35 = vsub.f32 %v77_v12, %v114_v33  ;;  %v217_v32 = vld [vmem:[%s413_s1] sm:$0xff] }
 0x108   :  { %v126_v36 = vmul.f32 %v342_v34, %v342_v34  ;;  %v124_v37 = vmul.f32 %v344_v35, %v344_v35 }
 0x10a   :  { %v106_v38 = vpop.xlane.xlu2 %105  ;;  %v135_v39 = vsel %vm58_vm0, %v126_v36, 0.0  ;;  %v129_v40 = vsel %vm58_vm0, %v124_v37, 0.0 }
 0x10b   :  { %136 = vadd.xlane.f32.xlu1 %v135_v39  ;;  %v103_v41 = vpop.xlane.xlu1 %102  ;;  %130 = vadd.xlane.f32.xlu2 %v129_v40  ;;  %v97_v42 = vpop.xlane.xlu0 %96  ;;  %v118_v45 = vmul.f32 %v113_v29, %v106_v38 }
 0x10c   :  { %v117_v43 = vmul.f32 %v113_v29, %v103_v41  ;;  %v115_v44 = vmul.f32 %v113_v29, %v97_v42 }
 0x10d   :  { %v360_v50 = vsub.f32 %v87_v16, %v118_v45 }
 0x10e   :  { %v352_v46 = vsub.f32 %v84_v19, %v117_v43  ;;  %v354_v47 = vsub.f32 %v79_v18, %v115_v44 }
 0x10f   :  { %v128_v53 = vmul.f32 %v360_v50, %v360_v50 }
 0x110   :  { %v127_v48 = vmul.f32 %v352_v46, %v352_v46  ;;  %v125_v49 = vmul.f32 %v354_v47, %v354_v47 }
 0x111   :  { %v141_v54 = vsel %vm58_vm0, %v128_v53, 0.0 }
 0x112   :  { %v138_v51 = vsel %vm58_vm0, %v127_v48, 0.0  ;;  %v132_v52 = vsel %vm58_vm0, %v125_v49, 0.0  ;;  %v220_v49 = vld [vmem:[%s413_s1 + $0x18] sm:$0xff] }
 0x113   :  { %139 = vadd.xlane.f32.xlu2 %v138_v51  ;;  %133 = vadd.xlane.f32.xlu0 %v132_v52 }
 0x11b   :  { %142 = vadd.xlane.f32.xlu0 %v141_v54  ;;  %v218_v54 = vld [vmem:[%s413_s1 + $0x8] sm:$0xff] }
 0x17e   :  { %v137_v55 = vpop.xlane.xlu1 %136  ;;  %v131_v56 = vpop.xlane.xlu2 %130 }
 0x17f   :  { %v146_v57 = vmul.f32 %v137_v55, %v113_v29  ;;  %v144_v58 = vmul.f32 %v131_v56, %v113_v29 }
 0x181   :  { %v151_v59 = vadd.f32 1e-05, %v146_v57  ;;  %v149_v60 = vadd.f32 1e-05, %v144_v58 }
 0x183   :  { %271 = vrsqrt.f32 %v151_v59  ;;  %vm180_vm4 = vweird.f32 %v151_v59  ;;  %vm160_vm6 = vweird.f32 %v149_v60 }
 0x184   :  { %273 = vrsqrt.f32 %v149_v60 }
 0x186   :  { %v140_v61 = vpop.xlane.xlu2 %139  ;;  %v134_v62 = vpop.xlane.xlu0 %133 }
 0x187   :  { %v147_v63 = vmul.f32 %v140_v61, %v113_v29  ;;  %v145_v0 = vmul.f32 %v134_v62, %v113_v29 }
 0x189   :  { %v272_v1 = vpop.eup %271  ;;  %v152_v2 = vadd.f32 1e-05, %v147_v63  ;;  %v150_v3 = vadd.f32 1e-05, %v145_v0 }
 0x18a   :  { %v274_v4 = vpop.eup %273  ;;  %v175_v5 = vmul.f32 %v272_v1, %v151_v59  ;;  %vm181_vm2 = vweird.f32 %v272_v1 }
 0x18b   :  { %v155_v6 = vmul.f32 %v274_v4, %v149_v60  ;;  %275 = vrsqrt.f32 %v152_v2  ;;  %vm161_vm3 = vweird.f32 %v274_v4  ;;  %vm182_vm5 = vmor %vm180_vm4, %vm181_vm2  ;;  %vm190_vm10 = vweird.f32 %v152_v2  ;;  %v221_v60 = vld [vmem:[%s413_s1 + $0x20] sm:$0xff] }
 0x18c   :  { %v176_v7 = vmul.f32 %v272_v1, %v175_v5  ;;  %277 = vrsqrt.f32 %v150_v3  ;;  %vm162_vm7 = vmor %vm160_vm6, %vm161_vm3  ;;  %vm170_vm12 = vweird.f32 %v150_v3 }
 0x18d   :  { %v156_v8 = vmul.f32 %v274_v4, %v155_v6 }
 0x18e   :  { %v177_v9 = vmul.f32 0.5, %v176_v7  ;;  %v143_v10 = vpop.xlane.xlu0 %142 }
 0x18f   :  { %v157_v11 = vmul.f32 0.5, %v156_v8  ;;  %v148_v12 = vmul.f32 %v143_v10, %v113_v29 }
 0x190   :  { %v178_v13 = vsub.f32 1.5, %v177_v9 }
 0x191   :  { %v276_v14 = vpop.eup %275  ;;  %v158_v15 = vsub.f32 1.5, %v157_v11  ;;  %v153_v16 = vadd.f32 1e-05, %v148_v12 }
 0x192   :  { %v278_v17 = vpop.eup %277  ;;  %v179_v18 = vmul.f32 %v272_v1, %v178_v13  ;;  %v185_v19 = vmul.f32 %v276_v14, %v152_v2  ;;  %vm191_vm8 = vweird.f32 %v276_v14 }
 0x193   :  { %v159_v21 = vmul.f32 %v274_v4, %v158_v15  ;;  %v165_v22 = vmul.f32 %v278_v17, %v150_v3  ;;  %279 = vrsqrt.f32 %v153_v16  ;;  %vm171_vm9 = vweird.f32 %v278_v17  ;;  %vm192_vm11 = vmor %vm190_vm10, %vm191_vm8 }
 0x194   :  { %v183_v23 = vsel %vm182_vm5, %v272_v1, %v179_v18  ;;  %v186_v24 = vmul.f32 %v276_v14, %v185_v19  ;;  %vm172_vm13 = vmor %vm170_vm12, %vm171_vm9  ;;  %vm200_vm15 = vweird.f32 %v153_v16 }
 0x195   :  { %v206_v25 = vmul.f32 %v183_v23, %v342_v34  ;;  %v163_v26 = vsel %vm162_vm7, %v274_v4, %v159_v21  ;;  %v166_v27 = vmul.f32 %v278_v17, %v165_v22 }
 0x196   :  { %v204_v29 = vmul.f32 %v163_v26, %v344_v35  ;;  %v187_v30 = vmul.f32 0.5, %v186_v24 }
 0x197   :  { %v214_v31 = vmul.f32 %v268_v20, %v206_v25  ;;  %v167_v33 = vmul.f32 0.5, %v166_v27 }
 0x198   :  { %v212_v36 = vmul.f32 %v268_v20, %v204_v29  ;;  %v188_v37 = vsub.f32 1.5, %v187_v30 }
 0x199   :  { %v280_v38 = vpop.eup %279  ;;  %v224_v34 = vadd.f32 %v219_v28, %v214_v31  ;;  %v168_v39 = vsub.f32 1.5, %v167_v33 }
 0x19a   :  { %v222_v40 = vadd.f32 %v217_v32, %v212_v36  ;;  %v189_v41 = vmul.f32 %v276_v14, %v188_v37  ;;  %v195_v42 = vmul.f32 %v280_v38, %v153_v16  ;;  %vm201_vm14 = vweird.f32 %v280_v38 }
 0x19b   :  { %229 = vst.msk [vmem:[%s414_s4 + $0x10] sm:$0xff] %vm58_vm0, %v224_v34  ;;  %v169_v35 = vmul.f32 %v278_v17, %v168_v39  ;;  %vm202_vm1 = vmor %vm200_vm15, %vm201_vm14 }
 0x19c   :  { %227 = vst.msk [vmem:[%s414_s4] sm:$0xff] %vm58_vm0, %v222_v40  ;;  %v193_v43 = vsel %vm192_vm11, %v276_v14, %v189_v41  ;;  %v196_v44 = vmul.f32 %v280_v38, %v195_v42 }
 0x19d   :  { %v207_v45 = vmul.f32 %v193_v43, %v352_v46  ;;  %v173_v48 = vsel %vm172_vm13, %v278_v17, %v169_v35 }
 0x19e   :  { %v205_v51 = vmul.f32 %v173_v48, %v354_v47  ;;  %v197_v52 = vmul.f32 0.5, %v196_v44 }
 0x19f   :  { %v215_v53 = vmul.f32 %v268_v20, %v207_v45 }
 0x1a0   :  { %v213_v55 = vmul.f32 %v268_v20, %v205_v51  ;;  %v198_v56 = vsub.f32 1.5, %v197_v52 }
 0x1a1   :  { %v225_v57 = vadd.f32 %v220_v49, %v215_v53 }
 0x1a2   :  { %v223_v58 = vadd.f32 %v218_v54, %v213_v55  ;;  %v199_v59 = vmul.f32 %v280_v38, %v198_v56 }
 0x1a3   :  { %230 = vst.msk [vmem:[%s414_s4 + $0x18] sm:$0xff] %vm58_vm0, %v225_v57 }
 0x1a4   :  { %228 = vst.msk [vmem:[%s414_s4 + $0x8] sm:$0xff] %vm58_vm0, %v223_v58  ;;  %v203_v46 = vsel %vm202_vm1, %v280_v38, %v199_v59 }
 0x1a5   :  { %v208_v47 = vmul.f32 %v203_v46, %v360_v50 }
 0x1a7   :  { %v216_v61 = vmul.f32 %v268_v20, %v208_v47 }
 0x1a9   :  { %v226_v62 = vadd.f32 %v221_v60, %v216_v61 }
 0x1ab   :  { %231 = vst.msk [vmem:[%s414_s4 + $0x20] sm:$0xff] %vm58_vm0, %v226_v62 }

// kernel: prior_network_forward.18
= control target key start
LH: loop header
LB: loop body
LE: loop exit
PB: predicated region body
PF: predicated region fallthrough
CT: control target
= control target key end

     0   :  { %vm24_vm0 = vcmask 523264   ;;  %v995_v10 = vmov 64.0   ;;  %s1482_s0 = inlined_call_operand.vmem [shape: f32[40,64], index: 0, kind: input, shape index: {}]   ;;  %s1483_s1 = inlined_call_operand.vmem [shape: f32[1,64], index: 1, kind: input, shape index: {}]   ;;  %s1484_s2 = inlined_call_operand.vmem [shape: bf16[64,512], index: 2, kind: input, shape index: {}]   ;;  %s1485_s3 = inlined_call_operand.vmem [shape: bf16[256,64], index: 3, kind: input, shape index: {}]   ;;  %s1486_s4 = inlined_call_operand.vmem [shape: f32[40,64], index: 4, kind: output, shape index: {}]  }
   0x1   :  { %v22_v0 = vld [vmem:[%s1482_s0 + $0x20] sm:$0xff]  ;;  %v1027_v1 = vld [vmem:[%s1482_s0 + $0x8] sm:$0xff]  ;;  %v21_v4 = vld [vmem:[%s1482_s0 + $0x18] sm:$0xff]  ;;  %941 = vrcp.f32 %v995_v10 }
   0x2   :  { %v37_v2 = vsel %vm24_vm0, %v22_v0, 0.0  ;;  %v28_v3 = vsel %vm24_vm0, %v1027_v1, 0.0  ;;  %v34_v5 = vsel %vm24_vm0, %v21_v4, 0.0  ;;  %v1039_v6 = vld [vmem:[%s1482_s0 + $0x10] sm:$0xff]  ;;  %v1044_v7 = vld [vmem:[%s1482_s0] sm:$0xff] }
   0x3   :  { %38 = vadd.xlane.f32.xlu0 %v37_v2  ;;  %29 = vadd.xlane.f32.xlu1 %v28_v3  ;;  %v31_v8 = vsel %vm24_vm0, %v1039_v6, 0.0  ;;  %v25_v9 = vsel %vm24_vm0, %v1044_v7, 0.0  ;;  %v799_v42 = vld [vmem:[%s1484_s2 + $0x60] sm:$0xf]  ;;  %v913_v43 = vld [vmem:[%s1484_s2 + $0x6c] sm:$0xf0] }
   0x4   :  { %35 = vadd.xlane.f32.xlu2 %v34_v5  ;;  %v911_v44 = vld [vmem:[%s1484_s2 + $0x64] sm:$0xf]  ;;  %v800_v45 = vor.u32 %v913_v43, %v799_v42  ;;  %v801_v46 = vld [vmem:[%s1484_s2 + $0x70] sm:$0xf0]  ;;  %v783_v48 = vld [vmem:[%s1484_s2 + $0x40] sm:$0xf] }
   0x5   :  { %v804_v47 = vor.u32 %v911_v44, %v801_v46  ;;  %v909_v49 = vld [vmem:[%s1484_s2 + $0x4c] sm:$0xf0]  ;;  %v907_v50 = vld [vmem:[%s1484_s2 + $0x44] sm:$0xf]  ;;  %v785_v52 = vld [vmem:[%s1484_s2 + $0x50] sm:$0xf0] }
   0x6   :  { %931 = vmatpush.bf16.msra.mxu2 %v800_v45  ;;  %262 = vmatpush.bf16.msra.mxu0 %v800_v45  ;;  %v784_v51 = vor.u32 %v909_v49, %v783_v48  ;;  %v788_v53 = vor.u32 %v907_v50, %v785_v52  ;;  %v767_v54 = vld [vmem:[%s1484_s2 + $0x20] sm:$0xf]  ;;  %v905_v55 = vld [vmem:[%s1484_s2 + $0x2c] sm:$0xf0]  ;;  %v903_v56 = vld [vmem:[%s1484_s2 + $0x24] sm:$0xf] }
   0x7   :  { %v942_v11 = vpop.eup %941  ;;  %935 = vmatpush.bf16.msra.mxu3 %v804_v47  ;;  %285 = vmatpush.bf16.msra.mxu1 %v804_v47  ;;  %v768_v57 = vor.u32 %v905_v55, %v767_v54  ;;  %v769_v58 = vld [vmem:[%s1484_s2 + $0x30] sm:$0xf0]  ;;  %v751_v60 = vld [vmem:[%s1484_s2] sm:$0xf]  ;;  %v901_v61 = vld [vmem:[%s1484_s2 + $0xc] sm:$0xf0] }
   0x8   :  { %v41_v12 = vmul.f32 64.0, %v942_v11  ;;  %vm45_vm1 = vweird.f32 %v942_v11  ;;  %v772_v59 = vor.u32 %v903_v56, %v769_v58  ;;  %v899_v62 = vld [vmem:[%s1484_s2 + $0x4] sm:$0xf]  ;;  %v752_v63 = vor.u32 %v901_v61, %v751_v60  ;;  %v807_v3 = vld [vmem:[%s1484_s2 + $0x68] sm:$0xf] }
   0x9   :  { %v912_v5 = vld [vmem:[%s1484_s2 + $0x6c] sm:$0xf] }
   0xa   :  { %v42_v13 = vsub.f32 1.0, %v41_v12  ;;  %932 = vmatpush.bf16.msra.mxu2 %v784_v51  ;;  %263 = vmatpush.bf16.msra.mxu0 %v784_v51 }
   0xb   :  { %32 = vadd.xlane.f32.xlu1 %v31_v8  ;;  %26 = vadd.xlane.f32.xlu0 %v25_v9  ;;  %v809_v9 = vld [vmem:[%s1484_s2 + $0x78] sm:$0xf0] }
   0xc   :  { %v43_v14 = vmul.f32 %v942_v11, %v42_v13  ;;  %936 = vmatpush.bf16.msra.mxu3 %v788_v53  ;;  %286 = vmatpush.bf16.msra.mxu1 %v788_v53  ;;  %v812_v10 = vor.u32 %v912_v5, %v809_v9  ;;  %v791_v13 = vld [vmem:[%s1484_s2 + $0x48] sm:$0xf] }
   0xe   :  { %v44_v15 = vadd.f32 %v942_v11, %v43_v14  ;;  %933 = vmatpush.bf16.msra.mxu2 %v768_v57  ;;  %264 = vmatpush.bf16.msra.mxu0 %v768_v57  ;;  %v910_v14 = vld [vmem:[%s1484_s2 + $0x54] sm:$0xf0] }
  0x10   :  { %v1050_v16 = vsel %vm45_vm1, %v942_v11, %v44_v15  ;;  %937 = vmatpush.bf16.msra.mxu3 %v772_v59  ;;  %287 = vmatpush.bf16.msra.mxu1 %v772_v59  ;;  %v908_v15 = vld [vmem:[%s1484_s2 + $0x4c] sm:$0xf] }
  0x12   :  { %934 = vmatpush.bf16.msra.mxu2 %v752_v63  ;;  %265 = vmatpush.bf16.msra.mxu0 %v752_v63 }
  0x76   :  { %v39_v17 = vpop.xlane.xlu0 %38  ;;  %v30_v18 = vpop.xlane.xlu1 %29 }
  0x77   :  { %v51_v19 = vmul.f32 %v1050_v16, %v39_v17  ;;  %v48_v20 = vmul.f32 %v1050_v16, %v30_v18  ;;  %v36_v25 = vpop.xlane.xlu2 %35 }
  0x78   :  { %v50_v32 = vmul.f32 %v1050_v16, %v36_v25 }
  0x79   :  { %v1054_v21 = vsub.f32 %v22_v0, %v51_v19  ;;  %v1057_v22 = vsub.f32 %v1027_v1, %v48_v20  ;;  %v753_v0 = vld [vmem:[%s1484_s2 + $0x10] sm:$0xf0]  ;;  %v792_v19 = vor.u32 %v910_v14, %v791_v13  ;;  %v793_v20 = vld [vmem:[%s1484_s2 + $0x58] sm:$0xf0] }
  0x7a   :  { %v1074_v35 = vsub.f32 %v21_v4, %v50_v32  ;;  %v756_v2 = vor.u32 %v899_v62, %v753_v0  ;;  %v914_v4 = vld [vmem:[%s1484_s2 + $0x74] sm:$0xf0]  ;;  %v759_v32 = vld [vmem:[%s1484_s2 + $0x8] sm:$0xf]  ;;  %v940_v0 = vld [vmem:[%s1483_s1] ss:$0 sm:$0xff] }
  0x7b   :  { %v61_v23 = vmul.f32 %v1054_v21, %v1054_v21  ;;  %v58_v24 = vmul.f32 %v1057_v22, %v1057_v22  ;;  %v808_v8 = vor.u32 %v914_v4, %v807_v3 }
  0x7c   :  { %v60_v40 = vmul.f32 %v1074_v35, %v1074_v35  ;;  %938 = vmatpush.bf16.msra.mxu3 %v756_v2  ;;  %288 = vmatpush.bf16.msra.mxu1 %v756_v2 }
  0x7d   :  { %v74_v26 = vsel %vm24_vm0, %v61_v23, 0.0  ;;  %v65_v27 = vsel %vm24_vm0, %v58_v24, 0.0  ;;  %308 = vmatpush.bf16.msrb.mxu2 %v808_v8  ;;  %v796_v23 = vor.u32 %v908_v15, %v793_v20 }
  0x7e   :  { %75 = vadd.xlane.f32.xlu2 %v74_v26  ;;  %66 = vadd.xlane.f32.xlu1 %v65_v27  ;;  %v33_v28 = vpop.xlane.xlu1 %32  ;;  %v27_v29 = vpop.xlane.xlu0 %26  ;;  %v71_v41 = vsel %vm24_vm0, %v60_v40, 0.0  ;;  %v775_v26 = vld [vmem:[%s1484_s2 + $0x28] sm:$0xf]  ;;  %v906_v27 = vld [vmem:[%s1484_s2 + $0x34] sm:$0xf0] }
  0x7f   :  { %v49_v30 = vmul.f32 %v1050_v16, %v33_v28  ;;  %v47_v31 = vmul.f32 %v1050_v16, %v27_v29  ;;  %v904_v28 = vld [vmem:[%s1484_s2 + $0x2c] sm:$0xf]  ;;  %v776_v29 = vor.u32 %v906_v27, %v775_v26 }
  0x80   :  { %331 = vmatpush.bf16.msrb.mxu3 %v812_v10 }
  0x81   :  { %v1069_v33 = vsub.f32 %v1039_v6, %v49_v30  ;;  %v1072_v34 = vsub.f32 %v1044_v7, %v47_v31  ;;  %309 = vmatpush.bf16.msrb.mxu2 %v792_v19  ;;  %v777_v30 = vld [vmem:[%s1484_s2 + $0x38] sm:$0xf0] }
  0x82   :  { %v780_v31 = vor.u32 %v904_v28, %v777_v30 }
  0x83   :  { %v59_v36 = vmul.f32 %v1069_v33, %v1069_v33  ;;  %v57_v37 = vmul.f32 %v1072_v34, %v1072_v34 }
  0x84   :  { %332 = vmatpush.bf16.msrb.mxu3 %v796_v23 }
  0x85   :  { %v68_v38 = vsel %vm24_vm0, %v59_v36, 0.0  ;;  %v62_v39 = vsel %vm24_vm0, %v57_v37, 0.0  ;;  %310 = vmatpush.bf16.msrb.mxu2 %v776_v29  ;;  %v902_v36 = vld [vmem:[%s1484_s2 + $0x14] sm:$0xf0]  ;;  %v900_v37 = vld [vmem:[%s1484_s2 + $0xc] sm:$0xf] }
  0x86   :  { %69 = vadd.xlane.f32.xlu2 %v68_v38  ;;  %63 = vadd.xlane.f32.xlu0 %v62_v39  ;;  %v760_v40 = vor.u32 %v902_v36, %v759_v32 }
  0x88   :  { %333 = vmatpush.bf16.msrb.mxu3 %v780_v31 }
  0x89   :  { %311 = vmatpush.bf16.msrb.mxu2 %v760_v40 }
  0x8e   :  { %72 = vadd.xlane.f32.xlu0 %v71_v41  ;;  %v761_v41 = vld [vmem:[%s1484_s2 + $0x18] sm:$0xf0] }
  0x8f   :  { %v764_v44 = vor.u32 %v900_v37, %v761_v41 }
  0x91   :  { %334 = vmatpush.bf16.msrb.mxu3 %v764_v44 }
  0xf1   :  { %v76_v11 = vpop.xlane.xlu2 %75  ;;  %v67_v12 = vpop.xlane.xlu1 %66 }
  0xf2   :  { %v81_v17 = vmul.f32 %v76_v11, %v1050_v16  ;;  %v78_v18 = vmul.f32 %v67_v12, %v1050_v16 }
  0xf4   :  { %v86_v24 = vadd.f32 1e-05, %v81_v17  ;;  %v83_v25 = vadd.f32 1e-05, %v78_v18 }
  0xf6   :  { %943 = vrsqrt.f32 %v86_v24  ;;  %vm133_vm3 = vweird.f32 %v86_v24  ;;  %vm103_vm5 = vweird.f32 %v83_v25 }
  0xf7   :  { %945 = vrsqrt.f32 %v83_v25 }
  0xf9   :  { %v70_v38 = vpop.xlane.xlu2 %69  ;;  %v64_v39 = vpop.xlane.xlu0 %63 }
  0xfa   :  { %v79_v42 = vmul.f32 %v70_v38, %v1050_v16  ;;  %v77_v43 = vmul.f32 %v64_v39, %v1050_v16 }
  0xfc   :  { %v944_v45 = vpop.eup %943  ;;  %v1185_v46 = vadd.f32 1e-05, %v79_v42  ;;  %v82_v47 = vadd.f32 1e-05, %v77_v43  ;;  %v921_v42 = vld [vmem:[%s1485_s3 + $0x30] sm:$0xff] }
  0xfd   :  { %v946_v48 = vpop.eup %945  ;;  %v128_v49 = vmul.f32 %v944_v45, %v86_v24  ;;  %vm134_vm2 = vweird.f32 %v944_v45  ;;  %v929_v43 = vld [vmem:[%s1485_s3 + $0x70] sm:$0xff] }
  0xfe   :  { %v98_v50 = vmul.f32 %v946_v48, %v83_v25  ;;  %947 = vrsqrt.f32 %v1185_v46  ;;  %vm135_vm4 = vmor %vm133_vm3, %vm134_vm2  ;;  %vm104_vm6 = vweird.f32 %v946_v48  ;;  %vm93_vm8 = vweird.f32 %v82_v47 }
  0xff   :  { %v129_v51 = vmul.f32 %v944_v45, %v128_v49  ;;  %949 = vrsqrt.f32 %v82_v47  ;;  %vm105_vm7 = vmor %vm103_vm5, %vm104_vm6  ;;  %vm113_vm13 = vweird.f32 %v1185_v46  ;;  %v927_v49 = vld [vmem:[%s1485_s3 + $0x60] sm:$0xff] }
 0x100   :  { %v99_v52 = vmul.f32 %v946_v48, %v98_v50 }
 0x101   :  { %v130_v53 = vmul.f32 0.5, %v129_v51  ;;  %v73_v54 = vpop.xlane.xlu0 %72 }
 0x102   :  { %v100_v55 = vmul.f32 0.5, %v99_v52  ;;  %v80_v56 = vmul.f32 %v73_v54, %v1050_v16  ;;  %v918_v54 = vld [vmem:[%s1485_s3 + $0x18] sm:$0xff] }
 0x103   :  { %v131_v57 = vsub.f32 1.5, %v130_v53 }
 0x104   :  { %v948_v58 = vpop.eup %947  ;;  %v101_v59 = vsub.f32 1.5, %v100_v55  ;;  %v85_v60 = vadd.f32 1e-05, %v80_v56  ;;  %v926_v55 = vld [vmem:[%s1485_s3 + $0x58] sm:$0xff]  ;;  %v917_v56 = vld [vmem:[%s1485_s3 + $0x10] sm:$0xff] }
 0x105   :  { %v950_v61 = vpop.eup %949  ;;  %v132_v62 = vmul.f32 %v944_v45, %v131_v57  ;;  %v108_v4 = vmul.f32 %v948_v58, %v1185_v46  ;;  %vm114_vm14 = vweird.f32 %v948_v58  ;;  %v920_v46 = vld [vmem:[%s1485_s3 + $0x28] sm:$0xff]  ;;  %v925_v57 = vld [vmem:[%s1485_s3 + $0x50] sm:$0xff] }
 0x106   :  { %v88_v63 = vmul.f32 %v950_v61, %v82_v47  ;;  %951 = vrsqrt.f32 %v85_v60  ;;  %v102_v3 = vmul.f32 %v946_v48, %v101_v59  ;;  %vm94_vm9 = vweird.f32 %v950_v61  ;;  %vm115_vm1 = vmor %vm113_vm13, %vm114_vm14  ;;  %v928_v47 = vld [vmem:[%s1485_s3 + $0x68] sm:$0xff] }
 0x107   :  { %v136_v2 = vsel %vm135_vm4, %v944_v45, %v132_v62  ;;  %v109_v12 = vmul.f32 %v948_v58, %v108_v4  ;;  %vm95_vm10 = vmor %vm93_vm8, %vm94_vm9  ;;  %vm123_vm11 = vweird.f32 %v85_v60  ;;  %v915_v4 = vld [vmem:[%s1485_s3] sm:$0xff] }
 0x108   :  { %v141_v16 = vmul.f32 %v136_v2, %v1054_v21  ;;  %v89_v5 = vmul.f32 %v950_v61, %v88_v63  ;;  %v106_v11 = vsel %vm105_vm7, %v946_v48, %v102_v3  ;;  %v919_v48 = vld [vmem:[%s1485_s3 + $0x20] sm:$0xff]  ;;  %v924_v3 = vld [vmem:[%s1485_s3 + $0x48] sm:$0xff] }
 0x109   :  { %v138_v21 = vmul.f32 %v106_v11, %v1057_v22  ;;  %v110_v19 = vmul.f32 0.5, %v109_v12 }
 0x10a   :  { %v90_v8 = vmul.f32 0.5, %v89_v5  ;;  %v149_v9 = vmul.f32 %v940_v0, %v141_v16  ;;  %v916_v16 = vld [vmem:[%s1485_s3 + $0x8] sm:$0xff]  ;;  %v923_v5 = vld [vmem:[%s1485_s3 + $0x40] sm:$0xff] }
 0x10b   :  { %v146_v27 = vmul.f32 %v940_v0, %v138_v21  ;;  %v111_v28 = vsub.f32 1.5, %v110_v19 }
 0x10c   :  { %v952_v10 = vpop.eup %951  ;;  %v91_v13 = vsub.f32 1.5, %v90_v8  ;;  %v152_v14 = vpack.c.bf16 %v149_v9, %v149_v9 }
 0x10d   :  { %v118_v15 = vmul.f32 %v952_v10, %v85_v60  ;;  %vm124_vm12 = vweird.f32 %v952_v10  ;;  %v112_v22 = vmul.f32 %v948_v58, %v111_v28 }
 0x10e   :  { %v92_v17 = vmul.f32 %v950_v61, %v91_v13  ;;  %815 = vmatmul.msk.bf16.vlgmr.msra.gmra.mxu2 %vm24_vm0, %v152_v14  ;;  %818 = vmatmul.msk.bf16.vlgmr.msra.gmra.mxu3 %vm24_vm0, %v152_v14  ;;  %vm125_vm15 = vmor %vm123_vm11, %vm124_vm12 }
 0x10f   :  { %v119_v18 = vmul.f32 %v952_v10, %v118_v15  ;;  %v116_v31 = vsel %vm115_vm1, %v948_v58, %v112_v22 }
 0x110   :  { %v96_v20 = vsel %vm95_vm10, %v950_v61, %v92_v17  ;;  %v139_v36 = vmul.f32 %v116_v31, %v1069_v33  ;;  %v930_v33 = vld [vmem:[%s1485_s3 + $0x78] sm:$0xff] }
 0x111   :  { %v137_v23 = vmul.f32 %v96_v20, %v1072_v34  ;;  %v120_v24 = vmul.f32 0.5, %v119_v18  ;;  %717 = vmatpush.bf16.msrb.mxu1 %v930_v33 }
 0x112   :  { %v147_v38 = vmul.f32 %v940_v0, %v139_v36 }
 0x113   :  { %v121_v25 = vsub.f32 1.5, %v120_v24  ;;  %v145_v26 = vmul.f32 %v940_v0, %v137_v23 }
 0x115   :  { %v150_v29 = vpack.c.bf16 %v146_v27, %v145_v26  ;;  %v122_v30 = vmul.f32 %v952_v10, %v121_v25  ;;  %718 = vmatpush.bf16.msrb.mxu1 %v929_v43 }
 0x117   :  { %813 = vmatmul.msk.bf16.vlgmr.msra.gmra.mxu0 %vm24_vm0, %v150_v29  ;;  %816 = vmatmul.msk.bf16.vlgmr.msra.gmra.mxu1 %vm24_vm0, %v150_v29  ;;  %v126_v34 = vsel %vm125_vm15, %v952_v10, %v122_v30 }
 0x118   :  { %v140_v32 = vmul.f32 %v126_v34, %v1074_v35  ;;  %v922_v35 = vld [vmem:[%s1485_s3 + $0x38] sm:$0xff] }
 0x119   :  { %694 = vmatpush.bf16.msrb.mxu0 %v922_v35  ;;  %719 = vmatpush.bf16.msrb.mxu1 %v928_v47 }
 0x11a   :  { %v148_v37 = vmul.f32 %v940_v0, %v140_v32 }
 0x11c   :  { %v151_v39 = vpack.c.bf16 %v148_v37, %v147_v38 }
 0x11d   :  { %695 = vmatpush.bf16.msrb.mxu0 %v921_v42  ;;  %720 = vmatpush.bf16.msrb.mxu1 %v927_v49 }
 0x11e   :  { %819 = vmatmul.msk.bf16.vlgmr.msrb.gmra.mxu2 %vm24_vm0, %v150_v29  ;;  %822 = vmatmul.msk.bf16.vlgmr.msrb.gmra.mxu3 %vm24_vm0, %v150_v29 }
 0x121   :  { %696 = vmatpush.bf16.msrb.mxu0 %v920_v46  ;;  %721 = vmatpush.bf16.msrb.mxu1 %v926_v55 }
 0x125   :  { %697 = vmatpush.bf16.msrb.mxu0 %v919_v48  ;;  %722 = vmatpush.bf16.msrb.mxu1 %v925_v57 }
 0x127   :  { %814 = vmatmul.msk.bf16.gmra.mxu0 %vm24_vm0, %v151_v39  ;;  %817 = vmatmul.msk.bf16.gmra.mxu1 %vm24_vm0, %v151_v39 }
 0x129   :  { %698 = vmatpush.bf16.msrb.mxu0 %v918_v54  ;;  %723 = vmatpush.bf16.msrb.mxu1 %v924_v3 }
 0x12d   :  { %699 = vmatpush.bf16.msrb.mxu0 %v917_v56  ;;  %724 = vmatpush.bf16.msrb.mxu1 %v923_v5 }
 0x12e   :  { %820 = vmatmul.msk.bf16.gmra.mxu2 %vm24_vm0, %v151_v39  ;;  %823 = vmatmul.msk.bf16.gmra.mxu3 %vm24_vm0, %v151_v39 }
 0x131   :  { %700 = vmatpush.bf16.msrb.mxu0 %v916_v16 }
 0x135   :  { %701 = vmatpush.bf16.msrb.mxu0 %v915_v4 }
 0x13e   :  { %821 = vmatmul.msk.bf16.gmra.mxu2 %vm24_vm0, %v152_v14  ;;  %824 = vmatmul.msk.bf16.gmra.mxu3 %vm24_vm0, %v152_v14 }
 0x191   :  { %v1217_v40 = vpop.f32.mrf.mxu2  ;;  %v1219_v41 = vpop.f32.mrf.mxu3 }
 0x194   :  { %v1293_v24 = vpop.f32.mrf.mxu0 }
 0x199   :  { %v279_v44 = vpop.f32.mrf.mxu2  ;;  %v302_v45 = vpop.f32.mrf.mxu3 }
 0x1a1   :  { %v1239_v50 = vpop.f32.mrf.mxu2  ;;  %v1241_v51 = vpop.f32.mrf.mxu3 }
 0x1a2   :  { %v825_v52 = vmul.f32 -1.442695, %v1239_v50  ;;  %v826_v53 = vmul.f32 -1.442695, %v1241_v51 }
 0x1a4   :  { %953 = vpow2.f32 %v825_v52 }
 0x1a5   :  { %955 = vpow2.f32 %v826_v53 }
 0x1a9   :  { %v1257_v58 = vpop.f32.mrf.mxu2  ;;  %v1259_v59 = vpop.f32.mrf.mxu3 }
 0x1aa   :  { %v954_v60 = vpop.eup %953  ;;  %v827_v61 = vmul.f32 -1.442695, %v1257_v58  ;;  %v828_v0 = vmul.f32 -1.442695, %v1259_v59 }
 0x1ab   :  { %v956_v62 = vpop.eup %955  ;;  %v380_v63 = vadd.f32 1.0, %v954_v60  ;;  %v1335_v60 = vpop.f32.mrf.mxu1 }
 0x1ac   :  { %v1263_v2 = vadd.f32 1.0, %v956_v62  ;;  %957 = vpow2.f32 %v827_v61 }
 0x1ad   :  { %959 = vrcp.f32 %v380_v63  ;;  %v399_v26 = vand.u32 2147483647, %v380_v63  ;;  %v401_v27 = vand.u32 2147483648, %v380_v63  ;;  %vm395_vm2 = vweird.f32 %v380_v63 }
 0x1ae   :  { %961 = vrcp.f32 %v1263_v2  ;;  %v414_v29 = vand.u32 2147483647, %v1263_v2  ;;  %v416_v32 = vand.u32 2147483648, %v1263_v2  ;;  %vm410_vm4 = vweird.f32 %v1263_v2 }
 0x1af   :  { %963 = vpow2.f32 %v828_v0  ;;  %vm1309_vm5 = vcmp.eq.f32.partialorder %v399_v26, 8.507059e+37  ;;  %v402_v42 = vor.u32 1.1754944e-38, %v401_v27 }
 0x1b0   :  { %vm1325_vm8 = vcmp.eq.f32.partialorder %v414_v29, 8.507059e+37  ;;  %v417_v53 = vor.u32 1.1754944e-38, %v416_v32 }
 0x1b1   :  { %v1278_v8 = vpop.f32.mrf.mxu2  ;;  %v1280_v9 = vpop.f32.mrf.mxu3 }
 0x1b2   :  { %v958_v10 = vpop.eup %957  ;;  %v829_v11 = vmul.f32 -1.442695, %v1278_v8  ;;  %v830_v14 = vmul.f32 -1.442695, %v1280_v9 }
 0x1b3   :  { %v960_v12 = vpop.eup %959  ;;  %v1283_v13 = vadd.f32 1.0, %v958_v10 }
 0x1b4   :  { %v1286_v15 = vpop.eup %961  ;;  %v391_v17 = vmul.f32 %v960_v12, %v380_v63  ;;  %965 = vpow2.f32 %v829_v11  ;;  %vm396_vm3 = vweird.f32 %v960_v12 }
 0x1b5   :  { %v964_v21 = vpop.eup %963  ;;  %v406_v18 = vmul.f32 %v1286_v15, %v1263_v2  ;;  %967 = vrcp.f32 %v1283_v13  ;;  %v429_v38 = vand.u32 2147483647, %v1283_v13  ;;  %v431_v39 = vand.u32 2147483648, %v1283_v13  ;;  %vm1315_vm6 = vmor %vm395_vm2, %vm396_vm3 }
 0x1b6   :  { %v392_v19 = vsub.f32 1.0, %v391_v17  ;;  %v1291_v20 = vadd.f32 1.0, %v964_v21  ;;  %969 = vpow2.f32 %v830_v14  ;;  %vm411_vm7 = vweird.f32 %v1286_v15  ;;  %v269_v17 = vpop.f32.mrf.mxu0 }
 0x1b7   :  { %v407_v23 = vsub.f32 1.0, %v406_v18  ;;  %vm425_vm9 = vweird.f32 %v1283_v13  ;;  %vm1330_vm10 = vcmp.eq.f32.partialorder %v429_v38, 8.507059e+37  ;;  %v432_v56 = vor.u32 1.1754944e-38, %v431_v39  ;;  %vm1339_vm11 = vmor %vm410_vm4, %vm411_vm7 }
 0x1b8   :  { %v393_v25 = vmul.f32 %v960_v12, %v392_v19  ;;  %971 = vrcp.f32 %v1291_v20  ;;  %v444_v63 = vand.u32 2147483647, %v1291_v20  ;;  %vm440_vm13 = vweird.f32 %v1291_v20 }
 0x1b9   :  { %v408_v28 = vmul.f32 %v1286_v15, %v407_v23  ;;  %v1298_v30 = vpop.f32.mrf.mxu2  ;;  %v1300_v22 = vpop.f32.mrf.mxu3 }
 0x1ba   :  { %v966_v34 = vpop.eup %965  ;;  %v394_v31 = vadd.f32 %v960_v12, %v393_v25  ;;  %v831_v36 = vmul.f32 -1.442695, %v1298_v30  ;;  %v832_v47 = vmul.f32 -1.442695, %v1300_v22  ;;  %vm445_vm1 = vcmp.eq.f32.partialorder %v444_v63, 8.507059e+37 }
 0x1bb   :  { %v968_v37 = vpop.eup %967  ;;  %v1307_v35 = vadd.f32 1.0, %v966_v34  ;;  %v409_v46 = vadd.f32 %v1286_v15, %v408_v28 }
 0x1bc   :  { %v421_v43 = vmul.f32 %v968_v37, %v1283_v13  ;;  %973 = vpow2.f32 %v831_v36  ;;  %v970_v44 = vpop.eup %969  ;;  %v398_v49 = vsel %vm1315_vm6, %v960_v12, %v394_v31  ;;  %vm426_vm12 = vweird.f32 %v968_v37 }
 0x1bd   :  { %975 = vrcp.f32 %v1307_v35  ;;  %v1344_v0 = vadd.f32 1.0, %v970_v44  ;;  %v403_v16 = vsel %vm1309_vm5, %v402_v42, %v398_v49  ;;  %v413_v3 = vsel %vm1339_vm11, %v1286_v15, %v409_v46  ;;  %vm427_vm14 = vmor %vm425_vm9, %vm426_vm12  ;;  %v292_v46 = vpop.f32.mrf.mxu1 }
 0x1be   :  { %v972_v48 = vpop.eup %971  ;;  %v422_v54 = vsub.f32 1.0, %v421_v43  ;;  %977 = vpow2.f32 %v832_v47  ;;  %v446_v12 = vand.u32 2147483648, %v1291_v20  ;;  %v540_v19 = vmul.f32 %v403_v16, %v1239_v50 }
 0x1bf   :  { %v436_v57 = vmul.f32 %v972_v48, %v1291_v20  ;;  %979 = vrcp.f32 %v1344_v0  ;;  %vm441_vm15 = vweird.f32 %v972_v48  ;;  %v418_v23 = vsel %vm1325_vm8, %v417_v53, %v413_v3 }
 0x1c0   :  { %v423_v62 = vmul.f32 %v968_v37, %v422_v54  ;;  %vm442_vm2 = vmor %vm440_vm13, %vm441_vm15  ;;  %v447_v50 = vor.u32 1.1754944e-38, %v446_v12  ;;  %v459_v34 = vand.u32 2147483647, %v1307_v35  ;;  %v541_v32 = vmul.f32 %v418_v23, %v1241_v51 }
 0x1c1   :  { %v437_v4 = vsub.f32 1.0, %v436_v57  ;;  %v1351_v2 = vpop.f32.mrf.mxu2  ;;  %v1353_v5 = vpop.f32.mrf.mxu3  ;;  %v550_v39 = vmul.f32 %v540_v19, %v1293_v24  ;;  %v461_v43 = vand.u32 2147483648, %v1307_v35  ;;  %vm455_vm4 = vweird.f32 %v1307_v35 }
 0x1c2   :  { %v974_v10 = vpop.eup %973  ;;  %v424_v11 = vadd.f32 %v968_v37, %v423_v62  ;;  %v833_v18 = vmul.f32 -1.442695, %v1351_v2  ;;  %v551_v55 = vmul.f32 %v541_v32, %v1335_v60  ;;  %vm1402_vm6 = vcmp.eq.f32.partialorder %v459_v34, 8.507059e+37 }
 0x1c3   :  { %v1358_v14 = vpop.eup %975  ;;  %v438_v15 = vmul.f32 %v972_v48, %v437_v4  ;;  %v1363_v21 = vadd.f32 1.0, %v974_v10  ;;  %v476_v60 = vand.u32 2147483648, %v1344_v0  ;;  %vm470_vm9 = vweird.f32 %v1344_v0 }
 0x1c4   :  { %v428_v25 = vsel %vm427_vm14, %v968_v37, %v424_v11  ;;  %v451_v26 = vmul.f32 %v1358_v14, %v1307_v35  ;;  %v978_v31 = vpop.eup %977  ;;  %v834_v37 = vmul.f32 -1.442695, %v1353_v5  ;;  %vm456_vm3 = vweird.f32 %v1358_v14 }
 0x1c5   :  { %v433_v27 = vsel %vm1330_vm10, %v432_v56, %v428_v25  ;;  %v439_v13 = vadd.f32 %v972_v48, %v438_v15  ;;  %981 = vrcp.f32 %v1363_v21  ;;  %v1380_v38 = vpop.eup %979  ;;  %v272_v56 = vpop.f32.mrf.mxu0  ;;  %vm1398_vm5 = vmor %vm455_vm4, %vm456_vm3  ;;  %v462_v35 = vor.u32 1.1754944e-38, %v461_v43 }
 0x1c6   :  { %v542_v28 = vmul.f32 %v433_v27, %v1257_v58  ;;  %v452_v29 = vsub.f32 1.0, %v451_v26  ;;  %983 = vpow2.f32 %v833_v18  ;;  %v466_v51 = vmul.f32 %v1380_v38, %v1344_v0 }
 0x1c7   :  { %v443_v36 = vsel %vm442_vm2, %v972_v48, %v439_v13  ;;  %v1390_v48 = vadd.f32 1.0, %v978_v31  ;;  %985 = vpow2.f32 %v834_v37  ;;  %vm471_vm7 = vweird.f32 %v1380_v38 }
 0x1c8   :  { %v552_v33 = vmul.f32 %v542_v28, %v269_v17  ;;  %v448_v58 = vsel %vm445_vm1, %v447_v50, %v443_v36  ;;  %v453_v20 = vmul.f32 %v1358_v14, %v452_v29  ;;  %v467_v53 = vsub.f32 1.0, %v466_v51  ;;  %vm1423_vm10 = vmor %vm470_vm9, %vm471_vm7  ;;  %v295_v50 = vpop.f32.mrf.mxu1 }
 0x1c9   :  { %v543_v42 = vmul.f32 %v448_v58, %v1259_v59  ;;  %v325_v44 = vpop.f32.mrf.mxu2  ;;  %v348_v45 = vpop.f32.mrf.mxu3  ;;  %987 = vrcp.f32 %v1390_v48  ;;  %v489_v4 = vand.u32 2147483647, %v1363_v21  ;;  %v491_v10 = vand.u32 2147483648, %v1363_v21 }
 0x1ca   :  { %v454_v47 = vadd.f32 %v1358_v14, %v453_v20  ;;  %v560_v24 = vpack.c.bf16 %v552_v33, %v550_v39  ;;  %v468_v62 = vmul.f32 %v1380_v38, %v467_v53  ;;  %v474_v25 = vand.u32 2147483647, %v1344_v0 }
 0x1cb   :  { %v982_v49 = vpop.eup %981  ;;  %v553_v52 = vmul.f32 %v543_v42, %v292_v46  ;;  %vm485_vm11 = vweird.f32 %v1363_v21  ;;  %v477_v27 = vor.u32 1.1754944e-38, %v476_v60  ;;  %vm490_vm13 = vcmp.eq.f32.partialorder %v489_v4, 8.507059e+37 }
 0x1cc   :  { %v481_v59 = vmul.f32 %v982_v49, %v1363_v21  ;;  %702 = vmatmul.bf16.vlgmr.msrb.gmra.mxu0 %v560_v24  ;;  %v984_v54 = vpop.eup %983  ;;  %v458_v63 = vsel %vm1398_vm5, %v1358_v14, %v454_v47  ;;  %v469_v17 = vadd.f32 %v1380_v38, %v468_v62  ;;  %vm486_vm8 = vweird.f32 %v982_v49 }
 0x1cd   :  { %v1411_v3 = vadd.f32 1.0, %v984_v54  ;;  %v561_v11 = vpack.c.bf16 %v553_v52, %v551_v55  ;;  %v986_v12 = vpop.eup %985  ;;  %v463_v14 = vsel %vm1402_vm6, %v462_v35, %v458_v63  ;;  %vm487_vm12 = vmor %vm485_vm11, %vm486_vm8  ;;  %v492_v13 = vor.u32 1.1754944e-38, %v491_v10  ;;  %v274_v33 = vpop.f32.mrf.mxu0 }
 0x1ce   :  { %v482_v16 = vsub.f32 1.0, %v481_v59  ;;  %v1421_v18 = vadd.f32 1.0, %v986_v12  ;;  %v544_v29 = vmul.f32 %v463_v14, %v1278_v8  ;;  %v473_v34 = vsel %vm1423_vm10, %v1380_v38, %v469_v17 }
 0x1cf   :  { %989 = vrcp.f32 %v1411_v3  ;;  %725 = vmatmul.bf16.vlgmr.msrb.gmra.mxu1 %v561_v11  ;;  %v988_v19 = vpop.eup %987  ;;  %v504_v21 = vand.u32 2147483647, %v1390_v48  ;;  %v506_v36 = vand.u32 2147483648, %v1390_v48  ;;  %vm475_vm14 = vcmp.eq.f32.partialorder %v474_v25, 8.507059e+37 }
 0x1d0   :  { %v483_v15 = vmul.f32 %v982_v49, %v482_v16  ;;  %v496_v28 = vmul.f32 %v988_v19, %v1390_v48  ;;  %991 = vrcp.f32 %v1421_v18  ;;  %v478_v58 = vsel %vm475_vm14, %v477_v27, %v473_v34 }
 0x1d1   :  { %vm501_vm15 = vweird.f32 %v988_v19  ;;  %vm500_vm1 = vweird.f32 %v1390_v48  ;;  %v554_v38 = vmul.f32 %v544_v29, %v272_v56  ;;  %vm505_vm2 = vcmp.eq.f32.partialorder %v504_v21, 8.507059e+37 }
 0x1d2   :  { %v484_v26 = vadd.f32 %v982_v49, %v483_v15  ;;  %v497_v32 = vsub.f32 1.0, %v496_v28  ;;  %v507_v51 = vor.u32 1.1754944e-38, %v506_v36  ;;  %v545_v46 = vmul.f32 %v478_v58, %v1280_v9  ;;  %vm502_vm3 = vmor %vm500_vm1, %vm501_vm15  ;;  %v297_v9 = vpop.f32.mrf.mxu1 }
 0x1d3   :  { %v521_v47 = vand.u32 2147483648, %v1411_v3  ;;  %vm515_vm5 = vweird.f32 %v1411_v3  ;;  %v536_v60 = vand.u32 2147483648, %v1421_v18  ;;  %vm530_vm9 = vweird.f32 %v1421_v18 }
 0x1d4   :  { %v488_v31 = vsel %vm487_vm12, %v982_v49, %v484_v26  ;;  %v498_v8 = vmul.f32 %v988_v19, %v497_v32  ;;  %v555_v57 = vmul.f32 %v545_v46, %v295_v50 }
 0x1d5   :  { %v493_v0 = vsel %vm490_vm13, %v492_v13, %v488_v31  ;;  %v990_v37 = vpop.eup %989  ;;  %v522_v56 = vor.u32 1.1754944e-38, %v521_v47  ;;  %v537_v11 = vor.u32 1.1754944e-38, %v536_v60 }
 0x1d6   :  { %v546_v39 = vmul.f32 %v493_v0, %v1298_v30  ;;  %v511_v20 = vmul.f32 %v990_v37, %v1411_v3  ;;  %v499_v43 = vadd.f32 %v988_v19, %v498_v8  ;;  %v992_v45 = vpop.eup %991  ;;  %v519_v30 = vand.u32 2147483647, %v1411_v3 }
 0x1d7   :  { %vm516_vm4 = vweird.f32 %v990_v37  ;;  %v526_v48 = vmul.f32 %v992_v45, %v1421_v18  ;;  %vm531_vm8 = vweird.f32 %v992_v45 }
 0x1d8   :  { %v556_v42 = vmul.f32 %v546_v39, %v274_v33  ;;  %v512_v44 = vsub.f32 1.0, %v511_v20  ;;  %v503_v49 = vsel %vm502_vm3, %v988_v19, %v499_v43  ;;  %vm517_vm6 = vmor %vm515_vm5, %vm516_vm4  ;;  %vm520_vm7 = vcmp.eq.f32.partialorder %v519_v30, 8.507059e+37 }
 0x1d9   :  { %v508_v53 = vsel %vm505_vm2, %v507_v51, %v503_v49  ;;  %v527_v55 = vsub.f32 1.0, %v526_v48  ;;  %vm532_vm10 = vmor %vm530_vm9, %vm531_vm8 }
 0x1da   :  { %v562_v24 = vpack.c.bf16 %v556_v42, %v554_v38  ;;  %v513_v52 = vmul.f32 %v990_v37, %v512_v44  ;;  %v547_v59 = vmul.f32 %v508_v53, %v1300_v22  ;;  %v534_v22 = vand.u32 2147483647, %v1421_v18 }
 0x1db   :  { %v528_v35 = vmul.f32 %v992_v45, %v527_v55 }
 0x1dc   :  { %707 = vmatmul.bf16.gmra.mxu0 %v562_v24  ;;  %v514_v54 = vadd.f32 %v990_v37, %v513_v52  ;;  %v557_v62 = vmul.f32 %v547_v59, %v297_v9  ;;  %vm535_vm11 = vcmp.eq.f32.partialorder %v534_v22, 8.507059e+37 }
 0x1dd   :  { %v529_v16 = vadd.f32 %v992_v45, %v528_v35 }
 0x1de   :  { %v518_v61 = vsel %vm517_vm6, %v990_v37, %v514_v54  ;;  %v563_v4 = vpack.c.bf16 %v557_v62, %v555_v57 }
 0x1df   :  { %v523_v63 = vsel %vm520_vm7, %v522_v56, %v518_v61  ;;  %v533_v10 = vsel %vm532_vm10, %v992_v45, %v529_v16 }
 0x1e0   :  { %v548_v3 = vmul.f32 %v523_v63, %v1351_v2  ;;  %730 = vmatmul.bf16.gmra.mxu1 %v563_v4  ;;  %v538_v12 = vsel %vm535_vm11, %v537_v11, %v533_v10 }
 0x1e1   :  { %v549_v15 = vmul.f32 %v538_v12, %v1353_v5 }
 0x1e2   :  { %v558_v17 = vmul.f32 %v548_v3, %v1217_v40 }
 0x1e3   :  { %v559_v19 = vmul.f32 %v549_v15, %v1219_v41 }
 0x1e4   :  { %v564_v14 = vpack.c.bf16 %v558_v17, %v558_v17 }
 0x1e5   :  { %v565_v23 = vpack.c.bf16 %v559_v19, %v559_v19 }
 0x1ec   :  { %712 = vmatmul.bf16.gmra.mxu0 %v564_v14 }
 0x1f0   :  { %735 = vmatmul.bf16.gmra.mxu1 %v565_v23 }
 0x249   :  { %v703_v18 = vpop.f32.mrf.mxu0 }
 0x24a   :  { %v704_v25 = vadd.f32 %v703_v18, %v1044_v7 }
 0x24c   :  { %v726_v2 = vpop.f32.mrf.mxu1 }
 0x24d   :  { %v727_v26 = vadd.f32 %v726_v2, %v704_v25 }
 0x24f   :  { %740 = vst.msk [vmem:[%s1486_s4] sm:$0xff] %vm24_vm0, %v727_v26 }
 0x251   :  { %v705_v27 = vpop.f32.mrf.mxu0 }
 0x252   :  { %v706_v40 = vadd.f32 %v705_v27, %v1027_v1  ;;  %v993_v1 = vld [vmem:[%s1482_s0 + $0x18] sm:$0xff] }
 0x254   :  { %v728_v5 = vpop.f32.mrf.mxu1 }
 0x255   :  { %v729_v13 = vadd.f32 %v728_v5, %v706_v40 }
 0x257   :  { %741 = vst.msk [vmem:[%s1486_s4 + $0x8] sm:$0xff] %vm24_vm0, %v729_v13 }
 0x259   :  { %v708_v41 = vpop.f32.mrf.mxu0 }
 0x25a   :  { %v709_v7 = vadd.f32 %v708_v41, %v1039_v6  ;;  %v994_v6 = vld [vmem:[%s1482_s0 + $0x20] sm:$0xff] }
 0x25d   :  { %v731_v28 = vpop.f32.mrf.mxu1 }
 0x25e   :  { %v732_v50 = vadd.f32 %v731_v28, %v709_v7 }
 0x260   :  { %742 = vst.msk [vmem:[%s1486_s4 + $0x10] sm:$0xff] %vm24_vm0, %v732_v50 }
 0x261   :  { %v710_v29 = vpop.f32.mrf.mxu0 }
 0x262   :  { %v711_v34 = vadd.f32 %v993_v1, %v710_v29 }
 0x265   :  { %v733_v31 = vpop.f32.mrf.mxu1 }
 0x266   :  { %v734_v0 = vadd.f32 %v733_v31, %v711_v34 }
 0x268   :  { %743 = vst.msk [vmem:[%s1486_s4 + $0x18] sm:$0xff] %vm24_vm0, %v734_v0 }
 0x269   :  { %v713_v32 = vpop.f32.mrf.mxu0 }
 0x26a   :  { %v714_v21 = vadd.f32 %v994_v6, %v713_v32 }
 0x26d   :  { %v736_v36 = vpop.f32.mrf.mxu1 }
 0x26e   :  { %v737_v37 = vadd.f32 %v736_v36, %v714_v21 }
 0x270   :  { %744 = vst.msk [vmem:[%s1486_s4 + $0x20] sm:$0xff] %vm24_vm0, %v737_v37 }
 0x271   :  { %v715_v39 = vpop.f32.mrf.mxu0 }
 0x275   :  { %v738_v33 = vpop.f32.mrf.mxu1 }

// kernel: prior_network_forward.23
= control target key start
LH: loop header
LB: loop body
LE: loop exit
PB: predicated region body
PF: predicated region fallthrough
CT: control target
= control target key end

     0   :  { %vm21_vm0 = vcmask 523264   ;;  %s554_s0 = inlined_call_operand.vmem [shape: f32[40,64], index: 0, kind: input, shape index: {}]   ;;  %s555_s1 = inlined_call_operand.vmem [shape: f32[1,64], index: 1, kind: input, shape index: {}]   ;;  %s556_s2 = inlined_call_operand.vmem [shape: bf16[64,64], index: 2, kind: input, shape index: {}]   ;;  %s557_s3 = inlined_call_operand.vmem [shape: f32[40,64], index: 3, kind: output, shape index: {}]  }
   0x1   :  { %v392_v0 = vld [vmem:[%s554_s0 + $0x20] sm:$0xff]  ;;  %v397_v1 = vld [vmem:[%s554_s0 + $0x8] sm:$0xff]  ;;  %v402_v2 = vld [vmem:[%s554_s0 + $0x18] sm:$0xff] }
   0x2   :  { %v34_v3 = vsel %vm21_vm0, %v392_v0, -inf  ;;  %v25_v4 = vsel %vm21_vm0, %v397_v1, -inf  ;;  %v31_v5 = vsel %vm21_vm0, %v402_v2, -inf  ;;  %v413_v6 = vld [vmem:[%s554_s0 + $0x10] sm:$0xff]  ;;  %v418_v7 = vld [vmem:[%s554_s0] sm:$0xff] }
   0x3   :  { %35 = vmax.xlane.f32.xlu0 %v34_v3  ;;  %26 = vmax.xlane.f32.xlu1 %v25_v4  ;;  %v28_v8 = vsel %vm21_vm0, %v413_v6, -inf  ;;  %v22_v9 = vsel %vm21_vm0, %v418_v7, -inf }
   0x4   :  { %32 = vmax.xlane.f32.xlu2 %v31_v5 }
   0xb   :  { %29 = vmax.xlane.f32.xlu1 %v28_v8  ;;  %23 = vmax.xlane.f32.xlu0 %v22_v9 }
  0x76   :  { %v36_v10 = vpop.xlane.xlu0 %35  ;;  %v27_v11 = vpop.xlane.xlu1 %26 }
  0x77   :  { %346 = vrcp.f32 %v36_v10  ;;  %v424_v12 = vpop.xlane.xlu2 %32  ;;  %v106_v21 = vand.u32 2147483647, %v36_v10  ;;  %v108_v24 = vand.u32 2147483648, %v36_v10  ;;  %v61_v25 = vand.u32 2147483647, %v27_v11 }
  0x78   :  { %348 = vrcp.f32 %v27_v11  ;;  %v63_v27 = vand.u32 2147483648, %v27_v11  ;;  %vm57_vm2 = vweird.f32 %v27_v11  ;;  %vm102_vm4 = vweird.f32 %v36_v10 }
  0x79   :  { %350 = vrcp.f32 %v424_v12  ;;  %vm87_vm5 = vweird.f32 %v424_v12  ;;  %vm107_vm6 = vcmp.eq.f32.partialorder %v106_v21, 8.507059e+37  ;;  %v109_v32 = vor.u32 1.1754944e-38, %v108_v24 }
  0x7a   :  { %vm62_vm8 = vcmp.eq.f32.partialorder %v61_v25, 8.507059e+37  ;;  %v64_v37 = vor.u32 1.1754944e-38, %v63_v27  ;;  %v91_v57 = vand.u32 2147483647, %v424_v12  ;;  %v93_v58 = vand.u32 2147483648, %v424_v12 }
  0x7c   :  { %v94_v5 = vor.u32 1.1754944e-38, %v93_v58 }
  0x7d   :  { %v347_v13 = vpop.eup %346 }
  0x7e   :  { %v349_v14 = vpop.eup %348  ;;  %v98_v15 = vmul.f32 %v347_v13, %v36_v10  ;;  %v427_v16 = vpop.xlane.xlu1 %29  ;;  %vm103_vm1 = vweird.f32 %v347_v13 }
  0x7f   :  { %v429_v17 = vpop.xlane.xlu0 %23  ;;  %v431_v18 = vpop.eup %350  ;;  %v53_v19 = vmul.f32 %v349_v14, %v27_v11  ;;  %352 = vrcp.f32 %v427_v16  ;;  %vm58_vm3 = vweird.f32 %v349_v14  ;;  %vm104_vm7 = vmor %vm102_vm4, %vm103_vm1  ;;  %vm72_vm9 = vweird.f32 %v427_v16 }
  0x80   :  { %v99_v20 = vsub.f32 1.0, %v98_v15  ;;  %354 = vrcp.f32 %v429_v17  ;;  %v83_v23 = vmul.f32 %v431_v18, %v424_v12  ;;  %vm59_vm10 = vmor %vm57_vm2, %vm58_vm3  ;;  %v76_v41 = vand.u32 2147483647, %v427_v16 }
  0x81   :  { %v54_v22 = vsub.f32 1.0, %v53_v19  ;;  %v78_v45 = vand.u32 2147483648, %v427_v16  ;;  %vm88_vm11 = vweird.f32 %v431_v18  ;;  %v48_v51 = vand.u32 2147483648, %v429_v17 }
  0x82   :  { %v100_v26 = vmul.f32 %v347_v13, %v99_v20  ;;  %v84_v31 = vsub.f32 1.0, %v83_v23  ;;  %v46_v54 = vand.u32 2147483647, %v429_v17  ;;  %vm455_vm14 = vmor %vm87_vm5, %vm88_vm11  ;;  %vm42_vm15 = vweird.f32 %v429_v17 }
  0x83   :  { %v55_v28 = vmul.f32 %v349_v14, %v54_v22  ;;  %v79_v59 = vor.u32 1.1754944e-38, %v78_v45  ;;  %vm77_vm2 = vcmp.eq.f32.partialorder %v76_v41, 8.507059e+37  ;;  %v49_v63 = vor.u32 1.1754944e-38, %v48_v51  ;;  %v334_v45 = vld [vmem:[%s556_s2 + $0x10] sm:$0xff] }
  0x84   :  { %v101_v29 = vadd.f32 %v347_v13, %v100_v26  ;;  %v85_v46 = vmul.f32 %v431_v18, %v84_v31  ;;  %vm47_vm4 = vcmp.eq.f32.partialorder %v46_v54, 8.507059e+37  ;;  %vm92_vm5 = vcmp.eq.f32.partialorder %v91_v57, 8.507059e+37 }
  0x85   :  { %v353_v30 = vpop.eup %352  ;;  %v56_v33 = vadd.f32 %v349_v14, %v55_v28 }
  0x86   :  { %v355_v34 = vpop.eup %354  ;;  %v68_v35 = vmul.f32 %v353_v30, %v427_v16  ;;  %v105_v36 = vsel %vm104_vm7, %v347_v13, %v101_v29  ;;  %vm73_vm12 = vweird.f32 %v353_v30  ;;  %v86_v61 = vadd.f32 %v431_v18, %v85_v46  ;;  %v333_v46 = vld [vmem:[%s556_s2 + $0x8] sm:$0xff] }
  0x87   :  { %v38_v38 = vmul.f32 %v355_v34, %v429_v17  ;;  %v110_v39 = vsel %vm107_vm6, %v109_v32, %v105_v36  ;;  %v60_v40 = vsel %vm59_vm10, %v349_v14, %v56_v33  ;;  %vm43_vm13 = vweird.f32 %v355_v34  ;;  %vm74_vm1 = vmor %vm72_vm9, %vm73_vm12 }
  0x88   :  { %v69_v42 = vsub.f32 1.0, %v68_v35  ;;  %v111_v43 = vmul.f32 %v110_v39, %v392_v0  ;;  %v65_v44 = vsel %vm62_vm8, %v64_v37, %v60_v40  ;;  %vm44_vm3 = vmor %vm42_vm15, %vm43_vm13  ;;  %v90_v9 = vsel %vm455_vm14, %v431_v18, %v86_v61 }
  0x89   :  { %v39_v47 = vsub.f32 1.0, %v38_v38  ;;  %v66_v48 = vmul.f32 %v65_v44, %v397_v1  ;;  %v95_v12 = vsel %vm92_vm5, %v94_v5, %v90_v9  ;;  %v368_v14 = vmov 64.0   ;;  %v335_v44 = vld [vmem:[%s556_s2 + $0x18] sm:$0xff] }
  0x8a   :  { %v70_v49 = vmul.f32 %v353_v30, %v69_v42  ;;  %v124_v50 = vsel %vm21_vm0, %v111_v43, 0.0  ;;  %v96_v13 = vmul.f32 %v95_v12, %v402_v2  ;;  %356 = vrcp.f32 %v368_v14  ;;  %337 = vmatpush.bf16.msra.mxu2 %v335_v44  ;;  %285 = vmatpush.bf16.msra.mxu0 %v335_v44 }
  0x8b   :  { %v40_v52 = vmul.f32 %v355_v34, %v39_v47  ;;  %125 = vadd.xlane.f32.xlu2 %v124_v50  ;;  %v115_v53 = vsel %vm21_vm0, %v66_v48, 0.0  ;;  %336 = vmatpush.bf16.msra.mxu1 %v335_v44  ;;  %v332_v47 = vld [vmem:[%s556_s2] sm:$0xff] }
  0x8c   :  { %116 = vadd.xlane.f32.xlu1 %v115_v53  ;;  %v71_v55 = vadd.f32 %v353_v30, %v70_v49 }
  0x8d   :  { %v41_v60 = vadd.f32 %v355_v34, %v40_v52 }
  0x8e   :  { %v75_v62 = vsel %vm74_vm1, %v353_v30, %v71_v55  ;;  %339 = vmatpush.bf16.msra.mxu2 %v334_v45  ;;  %286 = vmatpush.bf16.msra.mxu0 %v334_v45 }
  0x8f   :  { %v80_v0 = vsel %vm77_vm2, %v79_v59, %v75_v62  ;;  %v45_v1 = vsel %vm44_vm3, %v355_v34, %v41_v60  ;;  %338 = vmatpush.bf16.msra.mxu1 %v334_v45 }
  0x90   :  { %v81_v3 = vmul.f32 %v80_v0, %v413_v6  ;;  %v50_v4 = vsel %vm47_vm4, %v49_v63, %v45_v1  ;;  %v121_v6 = vsel %vm21_vm0, %v96_v13, 0.0 }
  0x91   :  { %v51_v8 = vmul.f32 %v50_v4, %v418_v7  ;;  %v357_v7 = vpop.eup %356 }
  0x92   :  { %v118_v10 = vsel %vm21_vm0, %v81_v3, 0.0  ;;  %v128_v15 = vmul.f32 64.0, %v357_v7  ;;  %vm132_vm6 = vweird.f32 %v357_v7  ;;  %341 = vmatpush.bf16.msra.mxu2 %v333_v46  ;;  %287 = vmatpush.bf16.msra.mxu0 %v333_v46 }
  0x93   :  { %119 = vadd.xlane.f32.xlu2 %v118_v10  ;;  %v112_v11 = vsel %vm21_vm0, %v51_v8, 0.0  ;;  %340 = vmatpush.bf16.msra.mxu1 %v333_v46 }
  0x94   :  { %113 = vadd.xlane.f32.xlu0 %v112_v11  ;;  %v129_v16 = vsub.f32 1.0, %v128_v15  ;;  %v345_v15 = vld [vmem:[%s555_s1] ss:$0 sm:$0xff] }
  0x96   :  { %v130_v17 = vmul.f32 %v357_v7, %v129_v16  ;;  %343 = vmatpush.bf16.msra.mxu2 %v332_v47  ;;  %288 = vmatpush.bf16.msra.mxu0 %v332_v47 }
  0x97   :  { %342 = vmatpush.bf16.msra.mxu1 %v332_v47 }
  0x98   :  { %v131_v18 = vadd.f32 %v357_v7, %v130_v17 }
  0x9a   :  { %v474_v19 = vsel %vm132_vm6, %v357_v7, %v131_v18 }
  0x9c   :  { %122 = vadd.xlane.f32.xlu0 %v121_v6 }
  0xfe   :  { %v126_v20 = vpop.xlane.xlu2 %125 }
  0xff   :  { %v138_v21 = vmul.f32 %v474_v19, %v126_v20  ;;  %v117_v22 = vpop.xlane.xlu1 %116 }
 0x100   :  { %v135_v23 = vmul.f32 %v474_v19, %v117_v22 }
 0x101   :  { %v478_v2 = vsub.f32 %v111_v43, %v138_v21 }
 0x102   :  { %v480_v24 = vsub.f32 %v66_v48, %v135_v23 }
 0x103   :  { %v148_v25 = vmul.f32 %v478_v2, %v478_v2 }
 0x104   :  { %v145_v26 = vmul.f32 %v480_v24, %v480_v24 }
 0x105   :  { %v161_v27 = vsel %vm21_vm0, %v148_v25, 0.0 }
 0x106   :  { %162 = vadd.xlane.f32.xlu1 %v161_v27  ;;  %v120_v28 = vpop.xlane.xlu2 %119  ;;  %v152_v29 = vsel %vm21_vm0, %v145_v26, 0.0 }
 0x107   :  { %v136_v30 = vmul.f32 %v474_v19, %v120_v28  ;;  %153 = vadd.xlane.f32.xlu0 %v152_v29  ;;  %v114_v31 = vpop.xlane.xlu0 %113 }
 0x108   :  { %v134_v32 = vmul.f32 %v474_v19, %v114_v31 }
 0x109   :  { %v490_v33 = vsub.f32 %v81_v3, %v136_v30 }
 0x10a   :  { %v492_v34 = vsub.f32 %v51_v8, %v134_v32 }
 0x10b   :  { %v146_v35 = vmul.f32 %v490_v33, %v490_v33 }
 0x10c   :  { %v144_v36 = vmul.f32 %v492_v34, %v492_v34 }
 0x10d   :  { %v155_v37 = vsel %vm21_vm0, %v146_v35, 0.0 }
 0x10e   :  { %156 = vadd.xlane.f32.xlu1 %v155_v37  ;;  %v149_v38 = vsel %vm21_vm0, %v144_v36, 0.0 }
 0x10f   :  { %150 = vadd.xlane.f32.xlu2 %v149_v38  ;;  %v123_v39 = vpop.xlane.xlu0 %122 }
 0x110   :  { %v137_v40 = vmul.f32 %v474_v19, %v123_v39 }
 0x112   :  { %v501_v41 = vsub.f32 %v96_v13, %v137_v40 }
 0x114   :  { %v147_v42 = vmul.f32 %v501_v41, %v501_v41 }
 0x116   :  { %v158_v43 = vsel %vm21_vm0, %v147_v42, 0.0 }
 0x117   :  { %159 = vadd.xlane.f32.xlu2 %v158_v43 }
 0x179   :  { %v163_v48 = vpop.xlane.xlu1 %162 }
 0x17a   :  { %v168_v49 = vmul.f32 %v163_v48, %v474_v19  ;;  %v154_v50 = vpop.xlane.xlu0 %153 }
 0x17b   :  { %v165_v51 = vmul.f32 %v154_v50, %v474_v19 }
 0x17c   :  { %v173_v52 = vadd.f32 1e-05, %v168_v49 }
 0x17d   :  { %v170_v53 = vadd.f32 1e-05, %v165_v51 }
 0x17e   :  { %358 = vrsqrt.f32 %v173_v52  ;;  %vm220_vm8 = vweird.f32 %v173_v52 }
 0x17f   :  { %360 = vrsqrt.f32 %v170_v53  ;;  %vm190_vm11 = vweird.f32 %v170_v53 }
 0x181   :  { %v157_v54 = vpop.xlane.xlu1 %156 }
 0x182   :  { %v166_v55 = vmul.f32 %v157_v54, %v474_v19  ;;  %v151_v56 = vpop.xlane.xlu2 %150 }
 0x183   :  { %v164_v57 = vmul.f32 %v151_v56, %v474_v19 }
 0x184   :  { %v359_v58 = vpop.eup %358  ;;  %v171_v59 = vadd.f32 1e-05, %v166_v55 }
 0x185   :  { %v361_v60 = vpop.eup %360  ;;  %v215_v61 = vmul.f32 %v359_v58, %v173_v52  ;;  %v169_v62 = vadd.f32 1e-05, %v164_v57  ;;  %vm221_vm7 = vweird.f32 %v359_v58 }
 0x186   :  { %v185_v63 = vmul.f32 %v361_v60, %v170_v53  ;;  %362 = vrsqrt.f32 %v171_v59  ;;  %vm222_vm9 = vmor %vm220_vm8, %vm221_vm7  ;;  %vm191_vm10 = vweird.f32 %v361_v60  ;;  %vm200_vm2 = vweird.f32 %v171_v59 }
 0x187   :  { %v216_v0 = vmul.f32 %v359_v58, %v215_v61  ;;  %364 = vrsqrt.f32 %v169_v62  ;;  %vm192_vm12 = vmor %vm190_vm11, %vm191_vm10  ;;  %vm180_vm14 = vweird.f32 %v169_v62 }
 0x188   :  { %v186_v1 = vmul.f32 %v361_v60, %v185_v63 }
 0x189   :  { %v217_v3 = vmul.f32 0.5, %v216_v0 }
 0x18a   :  { %v187_v4 = vmul.f32 0.5, %v186_v1  ;;  %v160_v5 = vpop.xlane.xlu2 %159 }
 0x18b   :  { %v218_v8 = vsub.f32 1.5, %v217_v3  ;;  %v167_v9 = vmul.f32 %v160_v5, %v474_v19 }
 0x18c   :  { %v363_v10 = vpop.eup %362  ;;  %v188_v11 = vsub.f32 1.5, %v187_v4 }
 0x18d   :  { %v365_v12 = vpop.eup %364  ;;  %v219_v13 = vmul.f32 %v359_v58, %v218_v8  ;;  %v195_v6 = vmul.f32 %v363_v10, %v171_v59  ;;  %v172_v14 = vadd.f32 1e-05, %v167_v9  ;;  %vm201_vm1 = vweird.f32 %v363_v10 }
 0x18e   :  { %v175_v7 = vmul.f32 %v365_v12, %v169_v62  ;;  %v189_v18 = vmul.f32 %v361_v60, %v188_v11  ;;  %vm181_vm13 = vweird.f32 %v365_v12  ;;  %vm202_vm3 = vmor %vm200_vm2, %vm201_vm1 }
 0x18f   :  { %v196_v16 = vmul.f32 %v363_v10, %v195_v6  ;;  %366 = vrsqrt.f32 %v172_v14  ;;  %v223_v17 = vsel %vm222_vm9, %v359_v58, %v219_v13  ;;  %vm182_vm15 = vmor %vm180_vm14, %vm181_vm13  ;;  %vm210_vm5 = vweird.f32 %v172_v14 }
 0x190   :  { %v176_v20 = vmul.f32 %v365_v12, %v175_v7  ;;  %v228_v19 = vmul.f32 %v223_v17, %v478_v2  ;;  %v193_v25 = vsel %vm192_vm12, %v361_v60, %v189_v18 }
 0x191   :  { %v197_v21 = vmul.f32 0.5, %v196_v16  ;;  %v225_v32 = vmul.f32 %v193_v25, %v480_v24 }
 0x192   :  { %v177_v22 = vmul.f32 0.5, %v176_v20  ;;  %v236_v23 = vmul.f32 %v345_v15, %v228_v19 }
 0x193   :  { %v198_v26 = vsub.f32 1.5, %v197_v21  ;;  %v233_v40 = vmul.f32 %v345_v15, %v225_v32 }
 0x194   :  { %v178_v27 = vsub.f32 1.5, %v177_v22  ;;  %v239_v28 = vpack.c.bf16 %v236_v23, %v236_v23 }
 0x195   :  { %v367_v29 = vpop.eup %366  ;;  %v199_v2 = vmul.f32 %v363_v10, %v198_v26 }
 0x196   :  { %v179_v30 = vmul.f32 %v365_v12, %v178_v27  ;;  %v205_v31 = vmul.f32 %v367_v29, %v172_v14  ;;  %331 = vmatmul.msk.bf16.vlgmr.msra.gmra.mxu2 %vm21_vm0, %v239_v28  ;;  %vm211_vm4 = vweird.f32 %v367_v29 }
 0x197   :  { %v203_v42 = vsel %vm202_vm3, %v363_v10, %v199_v2  ;;  %vm212_vm6 = vmor %vm210_vm5, %vm211_vm4 }
 0x198   :  { %v183_v35 = vsel %vm182_vm15, %v365_v12, %v179_v30  ;;  %v206_v36 = vmul.f32 %v367_v29, %v205_v31  ;;  %v226_v24 = vmul.f32 %v203_v42, %v490_v33 }
 0x199   :  { %v224_v37 = vmul.f32 %v183_v35, %v492_v34 }
 0x19a   :  { %v207_v38 = vmul.f32 0.5, %v206_v36  ;;  %v234_v34 = vmul.f32 %v345_v15, %v226_v24 }
 0x19b   :  { %v232_v39 = vmul.f32 %v345_v15, %v224_v37 }
 0x19c   :  { %v208_v43 = vsub.f32 1.5, %v207_v38 }
 0x19d   :  { %v237_v44 = vpack.c.bf16 %v233_v40, %v232_v39 }
 0x19e   :  { %v209_v45 = vmul.f32 %v367_v29, %v208_v43 }
 0x19f   :  { %329 = vmatmul.msk.bf16.vlgmr.msra.gmra.mxu0 %vm21_vm0, %v237_v44 }
 0x1a0   :  { %v213_v46 = vsel %vm212_vm6, %v367_v29, %v209_v45 }
 0x1a1   :  { %v227_v47 = vmul.f32 %v213_v46, %v501_v41 }
 0x1a3   :  { %v235_v48 = vmul.f32 %v345_v15, %v227_v47 }
 0x1a5   :  { %v238_v49 = vpack.c.bf16 %v235_v48, %v234_v34 }
 0x1a7   :  { %330 = vmatmul.msk.bf16.vlgmr.msra.gmra.mxu1 %vm21_vm0, %v238_v49 }
 0x219   :  { %v300_v50 = vpop.f32.mrf.mxu2 }
 0x21a   :  { %308 = vst.msk [vmem:[%s557_s3 + $0x20] sm:$0xff] %vm21_vm0, %v300_v50 }
 0x21c   :  { %v290_v51 = vpop.f32.mrf.mxu0 }
 0x21d   :  { %304 = vst.msk [vmem:[%s557_s3] sm:$0xff] %vm21_vm0, %v290_v51 }
 0x221   :  { %v302_v33 = vpop.f32.mrf.mxu2 }
 0x224   :  { %v292_v52 = vpop.f32.mrf.mxu0  ;;  %v295_v41 = vpop.f32.mrf.mxu1 }
 0x225   :  { %305 = vst.msk [vmem:[%s557_s3 + $0x8] sm:$0xff] %vm21_vm0, %v292_v52 }
 0x226   :  { %306 = vst.msk [vmem:[%s557_s3 + $0x10] sm:$0xff] %vm21_vm0, %v295_v41 }
 0x22c   :  { %v297_v53 = vpop.f32.mrf.mxu1 }
 0x22d   :  { %307 = vst.msk [vmem:[%s557_s3 + $0x18] sm:$0xff] %vm21_vm0, %v297_v53 }

</bundles_post_ra>
